<compile_context>
chip_gen: v5e
topology: v5e:2x2
jax: 0.10.0
libtpu: 0.0.40
codegen_flags: <defaults>
</compile_context>

<pallas_src>
import functools
import math

import jax
import jax.numpy as jnp
from jax.experimental import pallas as pl
from jax.experimental.pallas import tpu as pltpu


def _round_up(x, m):
    return (x + m - 1) // m * m


def _vmem_bytes(block_steps, return_sequence, b_pad, d_in, hp,
                x_bytes, out_bytes, w_bytes):
    """Rough per-grid-step VMEM footprint used for block sizing / vmem limit."""
    g4 = 4 * hp
    total = (d_in * g4 + hp * g4 + g4) * 2 * w_bytes      # W_ih, W_hh, bias (x2 bufs)
    total += 2 * b_pad * hp * 4                           # h/c carries (f32)
    total += 2 * block_steps * b_pad * d_in * x_bytes     # x block, double-buffered
    total += block_steps * b_pad * g4 * 4                 # pre-activation scratch f32
    if return_sequence:
        total += 2 * block_steps * b_pad * hp * out_bytes # seq out, double-buffered
    else:
        total += 2 * b_pad * hp * out_bytes               # resident final-h block
    return total


def _auto_block_steps(seq_len, b_pad, d_in, hp, x_bytes, out_bytes, w_bytes,
                      return_sequence, budget_bytes=20 * 1024 * 1024, max_steps=32):
    """Largest block_steps fitting the VMEM budget; prefer a divisor of seq_len."""
    bs = 1
    for cand in range(1, min(max_steps, seq_len) + 1):
        if _vmem_bytes(cand, return_sequence, b_pad, d_in, hp,
                       x_bytes, out_bytes, w_bytes) <= budget_bytes:
            bs = cand
    # Prefer a divisor of seq_len (skips the per-step time-padding mask entirely)
    # unless that would shrink the block by more than 2x.
    for cand in range(bs, 0, -1):
        if seq_len % cand == 0:
            if cand * 2 >= bs:
                return cand
            break
    return bs


def _lstm_fused_kernel(x_ref, wih_ref, whh_ref, bias_ref, out_ref,
                       pre_scr, h_scr, c_scr, *,
                       block_steps, seq_len, needs_mask, num_directions,
                       return_sequence):
    """One grid step == `block_steps` consecutive LSTM time steps of one direction.

    x_ref:    (block_steps*Bp, D)  input rows for this time-block (step-major)
    wih_ref:  (D, 4Hp)             input->gate weights   (resident across time axis)
    whh_ref:  (Hp, 4Hp)            hidden->gate weights  (resident across time axis)
    bias_ref: (1, 4Hp) f32         b_ih + b_hh, gate order [i, f, o, g]
    out_ref:  (block_steps, Bp, Hp) sequence block  OR  (Bp, Hp) final hidden state
    pre_scr:  (block_steps*Bp, 4Hp) f32   per-block input projection
    h_scr/c_scr: (Bp, Hp) f32      recurrent carries (persist across the grid)
    """
    d = pl.program_id(0)              # direction (0 = forward, 1 = backward)
    g = pl.program_id(1)              # time-block index, in processing order
    n_blk = pl.num_programs(1)
    bp, hp = h_scr.shape

    @pl.when(g == 0)
    def _():
        h_scr[...] = jnp.zeros_like(h_scr)
        c_scr[...] = jnp.zeros_like(c_scr)

    w_ih = wih_ref[...]
    w_hh = whh_ref[...]

    # Fused input projection for the whole time-block: one big MXU matmul
    # (block_steps*Bp, D) @ (D, 4Hp) with the bias folded in, parked in VMEM
    # scratch for cheap per-step (dynamic, sublane-aligned) reads.
    xb = x_ref[...].astype(w_ih.dtype)
    pre_scr[...] = (jnp.dot(xb, w_ih, preferred_element_type=jnp.float32)
                    + bias_ref[...])

    h = h_scr[...]
    c = c_scr[...]

    if num_directions == 1:
        is_fwd = None
        blk = g                                   # original time-block of this tile
    else:
        is_fwd = d == 0
        blk = jnp.where(is_fwd, g, n_blk - 1 - g)

    for i in range(block_steps):
        if num_directions == 1:
            row = i
            r0 = i * bp
        else:
            row = jnp.where(is_fwd, i, block_steps - 1 - i)
            r0 = pl.multiple_of(row * bp, bp)

        pre = pre_scr[pl.ds(r0, bp), :]                             # (Bp, 4Hp) f32
        gates = pre + jnp.dot(h.astype(w_hh.dtype), w_hh,
                              preferred_element_type=jnp.float32)
        # Packed gate order [i, f, o | g]: one sigmoid over 3*Hp + one tanh over Hp
        # (each slice is 128-lane aligned since Hp is a multiple of 128).
        sig = jax.nn.sigmoid(gates[:, :3 * hp])
        i_g = sig[:, 0 * hp:1 * hp]
        f_g = sig[:, 1 * hp:2 * hp]
        o_g = sig[:, 2 * hp:3 * hp]
        g_g = jnp.tanh(gates[:, 3 * hp:4 * hp])
        c_new = f_g * c + i_g * g_g
        h_new = o_g * jnp.tanh(c_new)

        if needs_mask:   # only emitted when T was padded up to a block multiple
            valid = blk * block_steps + row < seq_len
            h_new = jnp.where(valid, h_new, h)
            c_new = jnp.where(valid, c_new, c)

        if return_sequence:
            out_ref[row] = h_new.astype(out_ref.dtype)
        h, c = h_new, c_new

    h_scr[...] = h
    c_scr[...] = c
    if not return_sequence:
        # Final-h fast path: output block index is constant over the time axis,
        # so this stays resident in VMEM and is written back to HBM only once.
        out_ref[...] = h.astype(out_ref.dtype)


def _run_recurrence(x_blocks, wih, whh, bias, *, block_steps, b_pad, seq_len,
                    out_dtype, return_sequence, vmem_limit_bytes):
    """x_blocks: (n_blk, block_steps*Bp, D); wih: (n_dir, D, 4Hp);
    whh: (n_dir, Hp, 4Hp); bias: (n_dir, 1, 4Hp).

    Returns either (n_dir, Tp, Bp, Hp) hidden-state sequence (forward time order for
    BOTH directions) or (n_dir, Bp, Hp) final hidden states.
    """
    n_blk, rows, d_in = x_blocks.shape
    assert rows == block_steps * b_pad
    n_dir, hp, g4 = whh.shape
    t_pad = n_blk * block_steps

    def time_block(d, g):
        # forward (d==0): block g ; backward (d==1): block n_blk-1-g.
        return g + d * (n_blk - 1 - 2 * g)

    kernel = functools.partial(
        _lstm_fused_kernel,
        block_steps=block_steps, seq_len=seq_len,
        needs_mask=(seq_len != t_pad), num_directions=n_dir,
        return_sequence=return_sequence)

    in_specs = [
        # x time-block (shared by both directions; reversal is in the index map)
        pl.BlockSpec((None, rows, d_in), lambda d, g: (time_block(d, g), 0, 0)),
        # weights / bias: block index constant over the time axis => resident,
        # DMA'd only when the direction changes.
        pl.BlockSpec((None, d_in, g4), lambda d, g: (d, 0, 0)),
        pl.BlockSpec((None, hp, g4), lambda d, g: (d, 0, 0)),
        pl.BlockSpec((None, 1, g4), lambda d, g: (d, 0, 0)),
    ]
    if return_sequence:
        out_shape = jax.ShapeDtypeStruct((n_dir, t_pad, b_pad, hp), out_dtype)
        out_specs = pl.BlockSpec((None, block_steps, b_pad, hp),
                                 lambda d, g: (d, time_block(d, g), 0, 0))
    else:
        out_shape = jax.ShapeDtypeStruct((n_dir, b_pad, hp), out_dtype)
        out_specs = pl.BlockSpec((None, b_pad, hp), lambda d, g: (d, 0, 0))

    return pl.pallas_call(
        kernel,
        out_shape=out_shape,
        grid_spec=pltpu.PrefetchScalarGridSpec(
            num_scalar_prefetch=0,
            grid=(n_dir, n_blk),
            in_specs=in_specs,
            out_specs=out_specs,
            scratch_shapes=[
                pltpu.VMEM((rows, g4), jnp.float32),   # per-block pre-activations
                pltpu.VMEM((b_pad, hp), jnp.float32),  # h carry
                pltpu.VMEM((b_pad, hp), jnp.float32),  # c carry
            ],
        ),
        compiler_params=pltpu.CompilerParams(
            # direction axis is independent (megacore on v7x); time axis is serial
            dimension_semantics=("parallel", "arbitrary"),
            vmem_limit_bytes=vmem_limit_bytes),
    )(x_blocks, wih, whh, bias)


class LSTMEncoderPallas:
    """JAX/Pallas port of LSTMEncoder.forward (lengths=None path)."""

    # Packed gate order [i, f, o, g] (PyTorch order is i, f, g, o): sigmoid gates
    # contiguous so the kernel does one sigmoid over 3*Hp and one tanh over Hp.
    _GATE_ORDER = (0, 1, 3, 2)

    def __init__(self, input_size, hidden_size, bidirectional=False,
                 return_sequence=False, key=None,
                 weight_dtype=jnp.bfloat16, block_steps=None):
        self.input_size = input_size
        self.hidden_size = hidden_size
        self.bidirectional = bidirectional
        self.return_sequence = return_sequence
        self.weight_dtype = weight_dtype
        self.block_steps = block_steps

        if key is None:
            key = jax.random.PRNGKey(0)
        bound = 1.0 / math.sqrt(hidden_size)
        n_dir = 2 if bidirectional else 1
        keys = jax.random.split(key, 4 * n_dir)
        # Raw parameters kept in PyTorch layout/order for the reference check.
        self.params = []
        for d in range(n_dir):
            k0, k1, k2, k3 = keys[4 * d:4 * d + 4]
            w_ih = jax.random.uniform(k0, (4 * hidden_size, input_size),
                                      jnp.float32, -bound, bound)
            w_hh = jax.random.uniform(k1, (4 * hidden_size, hidden_size),
                                      jnp.float32, -bound, bound)
            b_ih = jax.random.uniform(k2, (4 * hidden_size,),
                                      jnp.float32, -bound, bound)
            b_hh = jax.random.uniform(k3, (4 * hidden_size,),
                                      jnp.float32, -bound, bound)
            self.params.append((w_ih, w_hh, b_ih, b_hh))

        # Pre-pack weights into an MXU / lane-friendly layout: per-gate transpose,
        # each gate zero-padded to Hp = round_up(H, 128) lanes, biases folded,
        # gate order [i, f, o, g].  Zero W_hh pad rows guarantee padded h lanes
        # never contaminate real lanes.
        H = hidden_size
        Hp = _round_up(H, 128)
        self._hp = Hp
        wih_l, whh_l, b_l = [], [], []
        for (w_ih, w_hh, b_ih, b_hh) in self.params:
            wih_g, whh_g, b_g = [], [], []
            for k in self._GATE_ORDER:
                wih_g.append(jnp.pad(w_ih[k * H:(k + 1) * H].T,
                                     ((0, 0), (0, Hp - H))))               # (D, Hp)
                whh_g.append(jnp.pad(w_hh[k * H:(k + 1) * H].T,
                                     ((0, Hp - H), (0, Hp - H))))          # (Hp, Hp)
                b_g.append(jnp.pad(b_ih[k * H:(k + 1) * H]
                                   + b_hh[k * H:(k + 1) * H], (0, Hp - H)))
            wih_l.append(jnp.concatenate(wih_g, axis=1))      # (D, 4Hp)
            whh_l.append(jnp.concatenate(whh_g, axis=1))      # (Hp, 4Hp)
            b_l.append(jnp.concatenate(b_g, axis=0))          # (4Hp,)
        self.wih_packed = jnp.stack(wih_l).astype(weight_dtype)    # (n_dir, D, 4Hp)
        self.whh_packed = jnp.stack(whh_l).astype(weight_dtype)    # (n_dir, Hp, 4Hp)
        self.bias_packed = jnp.stack(b_l).astype(jnp.float32)[:, None, :]  # (n_dir,1,4Hp)

    def __call__(self, inputs, lengths=None):
        # TODO(synk): the `lengths` path (sort + pack_padded_sequence /
        # pad_packed_sequence) has no clean Pallas equivalent; only the
        # lengths=None forward path is implemented.
        assert lengths is None
        B, T, D = inputs.shape
        H, Hp = self.hidden_size, self._hp

        w_bytes = jnp.dtype(self.weight_dtype).itemsize
        # Stream x in the weight dtype (bf16 halves the dominant HBM read).
        x_dtype = self.weight_dtype if w_bytes < 4 else inputs.dtype
        x_bytes = jnp.dtype(x_dtype).itemsize
        out_dtype = inputs.dtype
        out_bytes = jnp.dtype(out_dtype).itemsize
        # bf16 packs two rows per sublane (min tile (16,128)) -> round batch to 16.
        b_align = 16 if min(x_bytes, w_bytes) < 4 else 8
        Bp = _round_up(B, b_align)

        if self.block_steps is not None:
            bs = max(1, min(int(self.block_steps), T))
        else:
            bs = _auto_block_steps(T, Bp, D, Hp, x_bytes, out_bytes, w_bytes,
                                   self.return_sequence)
        n_blk = -(-T // bs)
        Tp = n_blk * bs

        # Time-major, pad batch/time, then pre-collapse each time-block's
        # (block_steps, Bp) rows into a single step-major row axis (free,
        # layout-preserving reshape) so the kernel needs no in-kernel reshapes.
        x = jnp.transpose(inputs, (1, 0, 2)).astype(x_dtype)        # (T, B, D)
        x = jnp.pad(x, ((0, Tp - T), (0, Bp - B), (0, 0)))          # (Tp, Bp, D)
        x = x.reshape(n_blk, bs * Bp, D)                            # (n_blk, bs*Bp, D)

        vmem_est = _vmem_bytes(bs, self.return_sequence, Bp, D, Hp,
                               x_bytes, out_bytes, w_bytes)
        # Raise the scoped-VMEM ceiling above the 16/32 MiB defaults but stay well
        # under v7x's 64 MiB physical VMEM.
        vmem_limit = int(min(max(2 * vmem_est, 32 * 1024 * 1024),
                             48 * 1024 * 1024))

        out = _run_recurrence(
            x, self.wih_packed, self.whh_packed, self.bias_packed,
            block_steps=bs, b_pad=Bp, seq_len=T, out_dtype=out_dtype,
            return_sequence=self.return_sequence, vmem_limit_bytes=vmem_limit)

        if self.return_sequence:
            seq = out[:, :T, :B, :H]                     # (n_dir, T, B, H)
            if self.bidirectional:
                res = jnp.concatenate([seq[0], seq[1]], axis=-1)   # bwd already in
            else:                                                   # forward order
                res = seq[0]
            return jnp.transpose(res, (1, 0, 2)).astype(inputs.dtype)  # (B, T, nd*H)

        h = out[:, :B, :H]                               # (n_dir, B, H)
        if self.bidirectional:
            res = jnp.concatenate([h[0], h[1]], axis=-1)
        else:
            res = h[0]
        return res.astype(inputs.dtype)                  # (B, nd*H)


def _reference_lstm(x, params, bidirectional):
    """Pure-JAX lax.scan reference. Returns (outputs (B,T,nd*H), h (B,nd*H))."""
    B = x.shape[0]

    def run(x_tbd, w_ih, w_hh, b_ih, b_hh):
        H = w_hh.shape[1]

        def step(carry, xt):
            h, c = carry
            gates = xt @ w_ih.T + h @ w_hh.T + b_ih + b_hh
            i = jax.nn.sigmoid(gates[:, 0 * H:1 * H])
            f = jax.nn.sigmoid(gates[:, 1 * H:2 * H])
            g = jnp.tanh(gates[:, 2 * H:3 * H])
            o = jax.nn.sigmoid(gates[:, 3 * H:4 * H])
            c = f * c + i * g
            h = o * jnp.tanh(c)
            return (h, c), h

        init = (jnp.zeros((B, H), jnp.float32), jnp.zeros((B, H), jnp.float32))
        (h, _), hs = jax.lax.scan(step, init, x_tbd)
        return h, hs

    x_t = jnp.transpose(x, (1, 0, 2)).astype(jnp.float32)
    h_f, hs_f = run(x_t, *params[0])
    if bidirectional:
        h_b, hs_b = run(x_t[::-1], *params[1])
        hs_b = hs_b[::-1]
        h = jnp.concatenate([h_f, h_b], axis=-1)
        hs = jnp.concatenate([hs_f, hs_b], axis=-1)
    else:
        h, hs = h_f, hs_f
    return jnp.transpose(hs, (1, 0, 2)), h


if __name__ == "__main__":
    B, T, D, H = 2, 8, 16, 32
    key = jax.random.PRNGKey(0)
    k_x, k_p1, k_p2 = jax.random.split(key, 3)
    x = jax.random.normal(k_x, (B, T, D), jnp.float32)

    # 1) Unidirectional, final hidden state only (fast path, no seq HBM stream),
    #    f32 weights -> strict check.
    enc = LSTMEncoderPallas(D, H, bidirectional=False, return_sequence=False,
                            key=k_p1, weight_dtype=jnp.float32)
    h = jax.block_until_ready(enc(x))
    assert h.shape == (B, H), h.shape
    _, h_ref = _reference_lstm(x, enc.params, bidirectional=False)
    assert jnp.allclose(h, h_ref, atol=1e-4, rtol=1e-4), \
        float(jnp.max(jnp.abs(h - h_ref)))

    # 2) Bidirectional, full sequence, f32 weights, ragged time blocking
    #    (T=8, block_steps=3 exercises time padding/masking + reversed direction).
    enc2 = LSTMEncoderPallas(D, H, bidirectional=True, return_sequence=True,
                             key=k_p2, weight_dtype=jnp.float32, block_steps=3)
    out = jax.block_until_ready(enc2(x))
    assert out.shape == (B, T, 2 * H), out.shape
    out_ref, h_ref2 = _reference_lstm(x, enc2.params, bidirectional=True)
    assert jnp.allclose(out, out_ref, atol=1e-4, rtol=1e-4), \
        float(jnp.max(jnp.abs(out - out_ref)))

    # 3) Bidirectional final-h fast path with ragged blocking (same params as 2).
    enc4 = LSTMEncoderPallas(D, H, bidirectional=True, return_sequence=False,
                             key=k_p2, weight_dtype=jnp.float32, block_steps=3)
    h4 = jax.block_until_ready(enc4(x))
    assert h4.shape == (B, 2 * H), h4.shape
    assert jnp.allclose(h4, h_ref2, atol=1e-4, rtol=1e-4), \
        float(jnp.max(jnp.abs(h4 - h_ref2)))

    # 4) Default bf16 weights + bf16 x stream (MXU-native, halved HBM/VMEM) with
    #    f32 accumulation / carries — loose tolerance.
    enc3 = LSTMEncoderPallas(D, H, bidirectional=False, return_sequence=False,
                             key=k_p1)
    h3 = jax.block_until_ready(enc3(x))
    err3 = float(jnp.max(jnp.abs(h3.astype(jnp.float32) - h_ref)))
    assert err3 < 0.1, err3

    print("KERNEL_OK")
</pallas_src>

<mosaic_0001>
module attributes {stable_mosaic.version = 11 : i64} {
  func.func @_lstm_fused_kernel(%arg0: i32, %arg1: i32, %arg2: memref<1x64x16xf32, #tpu.memory_space<vmem>>, %arg3: memref<1x16x512xf32, #tpu.memory_space<vmem>>, %arg4: memref<1x128x512xf32, #tpu.memory_space<vmem>>, %arg5: memref<1x1x512xf32, #tpu.memory_space<vmem>>, %arg6: memref<1x8x128xf32, #tpu.memory_space<vmem>>, %arg7: memref<64x512xf32, #tpu.memory_space<vmem>>, %arg8: memref<8x128xf32, #tpu.memory_space<vmem>>, %arg9: memref<8x128xf32, #tpu.memory_space<vmem>>) attributes {dimension_semantics = [#tpu.dimension_semantics<parallel>, #tpu.dimension_semantics<arbitrary>], iteration_bounds = array<i64: 1, 1>, scalar_prefetch = 0 : i64, scratch_operands = 3 : i64, tpu.core_type = #tpu.core_type<tc>, window_params = [{transform_indices = @transform_0, window_bounds = array<i64: 1, 64, 16>}, {transform_indices = @transform_1, window_bounds = array<i64: 1, 16, 512>}, {transform_indices = @transform_2, window_bounds = array<i64: 1, 128, 512>}, {transform_indices = @transform_3, window_bounds = array<i64: 1, 1, 512>}, {transform_indices = @transform_4, window_bounds = array<i64: 1, 8, 128>}]} {
    %c0_i32 = arith.constant 0 : i32
    %0 = arith.cmpi eq, %arg1, %c0_i32 : i32
    %1 = arith.extui %0 : i1 to i32
    %c0_i32_0 = arith.constant 0 : i32
    %2 = arith.cmpi ne, %1, %c0_i32_0 : i32
    scf.if %2 {
      %cst_50 = arith.constant 0.000000e+00 : f32
      %174 = vector.broadcast %cst_50 : f32 to vector<8x128xf32>
      %c0_51 = arith.constant 0 : index
      %c0_52 = arith.constant 0 : index
      %175 = vector.load %arg8[%c0_51, %c0_52] : memref<8x128xf32, #tpu.memory_space<vmem>>, vector<8x128xf32>
      tpu.vector_store %arg8[%c0_51, %c0_52], %174 {strides = array<i32>} : memref<8x128xf32, #tpu.memory_space<vmem>>, vector<8x128xf32>,
      %cst_53 = arith.constant 0.000000e+00 : f32
      %176 = vector.broadcast %cst_53 : f32 to vector<8x128xf32>
      %c0_54 = arith.constant 0 : index
      %c0_55 = arith.constant 0 : index
      %177 = vector.load %arg9[%c0_54, %c0_55] : memref<8x128xf32, #tpu.memory_space<vmem>>, vector<8x128xf32>
      tpu.vector_store %arg9[%c0_54, %c0_55], %176 {strides = array<i32>} : memref<8x128xf32, #tpu.memory_space<vmem>>, vector<8x128xf32>,
    } else {
    }
    %c0 = arith.constant 0 : index
    %c0_1 = arith.constant 0 : index
    %c0_2 = arith.constant 0 : index
    %3 = vector.load %arg3[%c0, %c0_1, %c0_2] : memref<1x16x512xf32, #tpu.memory_space<vmem>>, vector<1x16x512xf32>
    %4 = vector.shape_cast %3 : vector<1x16x512xf32> to vector<16x512xf32>
    %c0_3 = arith.constant 0 : index
    %c0_4 = arith.constant 0 : index
    %c0_5 = arith.constant 0 : index
    %5 = vector.load %arg4[%c0_3, %c0_4, %c0_5] : memref<1x128x512xf32, #tpu.memory_space<vmem>>, vector<1x128x512xf32>
    %6 = vector.shape_cast %5 : vector<1x128x512xf32> to vector<128x512xf32>
    %c0_6 = arith.constant 0 : index
    %c0_7 = arith.constant 0 : index
    %c0_8 = arith.constant 0 : index
    %7 = vector.load %arg2[%c0_6, %c0_7, %c0_8] : memref<1x64x16xf32, #tpu.memory_space<vmem>>, vector<1x64x16xf32>
    %8 = vector.shape_cast %7 : vector<1x64x16xf32> to vector<64x16xf32>
    %cst = arith.constant dense<0.000000e+00> : vector<64x512xf32>
    %9 = tpu.matmul %8, %4, %cst {dimension_numbers = #tpu.dot_dimension_numbers<[1], [0], [0], [1], [0, 0, 1, 1], [], []>} : vector<64x16xf32>, vector<16x512xf32>, vector<64x512xf32> -> vector<64x512xf32>
    %c0_9 = arith.constant 0 : index
    %c0_10 = arith.constant 0 : index
    %c0_11 = arith.constant 0 : index
    %10 = vector.load %arg5[%c0_9, %c0_10, %c0_11] : memref<1x1x512xf32, #tpu.memory_space<vmem>>, vector<1x1x512xf32>
    %11 = vector.shape_cast %10 : vector<1x1x512xf32> to vector<1x512xf32>
    %12 = vector.broadcast %11 : vector<1x512xf32> to vector<64x512xf32>
    %13 = arith.addf %9, %12 : vector<64x512xf32>
    %c0_12 = arith.constant 0 : index
    %c0_13 = arith.constant 0 : index
    %14 = vector.load %arg7[%c0_12, %c0_13] : memref<64x512xf32, #tpu.memory_space<vmem>>, vector<64x512xf32>
    tpu.vector_store %arg7[%c0_12, %c0_13], %13 {strides = array<i32>} : memref<64x512xf32, #tpu.memory_space<vmem>>, vector<64x512xf32>,
    %c0_14 = arith.constant 0 : index
    %c0_15 = arith.constant 0 : index
    %15 = vector.load %arg8[%c0_14, %c0_15] : memref<8x128xf32, #tpu.memory_space<vmem>>, vector<8x128xf32>
    %c0_16 = arith.constant 0 : index
    %c0_17 = arith.constant 0 : index
    %16 = vector.load %arg9[%c0_16, %c0_17] : memref<8x128xf32, #tpu.memory_space<vmem>>, vector<8x128xf32>
    %c0_18 = arith.constant 0 : index
    %c0_19 = arith.constant 0 : index
    %17 = vector.load %arg7[%c0_18, %c0_19] : memref<64x512xf32, #tpu.memory_space<vmem>>, vector<8x512xf32>
    %cst_20 = arith.constant dense<0.000000e+00> : vector<8x512xf32>
    %18 = tpu.matmul %15, %6, %cst_20 {dimension_numbers = #tpu.dot_dimension_numbers<[1], [0], [0], [1], [0, 0, 1, 1], [], []>} : vector<8x128xf32>, vector<128x512xf32>, vector<8x512xf32> -> vector<8x512xf32>
    %19 = arith.addf %17, %18 : vector<8x512xf32>
    %20 = vector.extract_strided_slice %19 {offsets = [0, 0], sizes = [8, 384], strides = [1, 1]} : vector<8x512xf32> to vector<8x384xf32>
    %21 = arith.negf %20 : vector<8x384xf32>
    %22 = math.exp %21 : vector<8x384xf32>
    %cst_21 = arith.constant 1.000000e+00 : f32
    %23 = vector.broadcast %cst_21 : f32 to vector<8x384xf32>
    %24 = arith.addf %23, %22 : vector<8x384xf32>
    %25 = arith.divf %23, %24 : vector<8x384xf32>
    %26 = vector.extract_strided_slice %25 {offsets = [0, 0], sizes = [8, 128], strides = [1, 1]} : vector<8x384xf32> to vector<8x128xf32>
    %27 = vector.extract_strided_slice %25 {offsets = [0, 128], sizes = [8, 128], strides = [1, 1]} : vector<8x384xf32> to vector<8x128xf32>
    %28 = vector.extract_strided_slice %25 {offsets = [0, 256], sizes = [8, 128], strides = [1, 1]} : vector<8x384xf32> to vector<8x128xf32>
    %29 = vector.extract_strided_slice %19 {offsets = [0, 384], sizes = [8, 128], strides = [1, 1]} : vector<8x512xf32> to vector<8x128xf32>
    %30 = math.tanh %29 : vector<8x128xf32>
    %31 = arith.mulf %27, %16 : vector<8x128xf32>
    %32 = arith.mulf %26, %30 : vector<8x128xf32>
    %33 = arith.addf %31, %32 : vector<8x128xf32>
    %34 = math.tanh %33 : vector<8x128xf32>
    %35 = arith.mulf %28, %34 : vector<8x128xf32>
    %c8 = arith.constant 8 : index
    %c0_22 = arith.constant 0 : index
    %36 = vector.load %arg7[%c8, %c0_22] : memref<64x512xf32, #tpu.memory_space<vmem>>, vector<8x512xf32>
    %cst_23 = arith.constant dense<0.000000e+00> : vector<8x512xf32>
    %37 = tpu.matmul %35, %6, %cst_23 {dimension_numbers = #tpu.dot_dimension_numbers<[1], [0], [0], [1], [0, 0, 1, 1], [], []>} : vector<8x128xf32>, vector<128x512xf32>, vector<8x512xf32> -> vector<8x512xf32>
    %38 = arith.addf %36, %37 : vector<8x512xf32>
    %39 = vector.extract_strided_slice %38 {offsets = [0, 0], sizes = [8, 384], strides = [1, 1]} : vector<8x512xf32> to vector<8x384xf32>
    %40 = arith.negf %39 : vector<8x384xf32>
    %41 = math.exp %40 : vector<8x384xf32>
    %cst_24 = arith.constant 1.000000e+00 : f32
    %42 = vector.broadcast %cst_24 : f32 to vector<8x384xf32>
    %43 = arith.addf %42, %41 : vector<8x384xf32>
    %44 = arith.divf %42, %43 : vector<8x384xf32>
    %45 = vector.extract_strided_slice %44 {offsets = [0, 0], sizes = [8, 128], strides = [1, 1]} : vector<8x384xf32> to vector<8x128xf32>
    %46 = vector.extract_strided_slice %44 {offsets = [0, 128], sizes = [8, 128], strides = [1, 1]} : vector<8x384xf32> to vector<8x128xf32>
    %47 = vector.extract_strided_slice %44 {offsets = [0, 256], sizes = [8, 128], strides = [1, 1]} : vector<8x384xf32> to vector<8x128xf32>
    %48 = vector.extract_strided_slice %38 {offsets = [0, 384], sizes = [8, 128], strides = [1, 1]} : vector<8x512xf32> to vector<8x128xf32>
    %49 = math.tanh %48 : vector<8x128xf32>
    %50 = arith.mulf %46, %33 : vector<8x128xf32>
    %51 = arith.mulf %45, %49 : vector<8x128xf32>
    %52 = arith.addf %50, %51 : vector<8x128xf32>
    %53 = math.tanh %52 : vector<8x128xf32>
    %54 = arith.mulf %47, %53 : vector<8x128xf32>
    %c16 = arith.constant 16 : index
    %c0_25 = arith.constant 0 : index
    %55 = vector.load %arg7[%c16, %c0_25] : memref<64x512xf32, #tpu.memory_space<vmem>>, vector<8x512xf32>
    %cst_26 = arith.constant dense<0.000000e+00> : vector<8x512xf32>
    %56 = tpu.matmul %54, %6, %cst_26 {dimension_numbers = #tpu.dot_dimension_numbers<[1], [0], [0], [1], [0, 0, 1, 1], [], []>} : vector<8x128xf32>, vector<128x512xf32>, vector<8x512xf32> -> vector<8x512xf32>
    %57 = arith.addf %55, %56 : vector<8x512xf32>
    %58 = vector.extract_strided_slice %57 {offsets = [0, 0], sizes = [8, 384], strides = [1, 1]} : vector<8x512xf32> to vector<8x384xf32>
    %59 = arith.negf %58 : vector<8x384xf32>
    %60 = math.exp %59 : vector<8x384xf32>
    %cst_27 = arith.constant 1.000000e+00 : f32
    %61 = vector.broadcast %cst_27 : f32 to vector<8x384xf32>
    %62 = arith.addf %61, %60 : vector<8x384xf32>
    %63 = arith.divf %61, %62 : vector<8x384xf32>
    %64 = vector.extract_strided_slice %63 {offsets = [0, 0], sizes = [8, 128], strides = [1, 1]} : vector<8x384xf32> to vector<8x128xf32>
    %65 = vector.extract_strided_slice %63 {offsets = [0, 128], sizes = [8, 128], strides = [1, 1]} : vector<8x384xf32> to vector<8x128xf32>
    %66 = vector.extract_strided_slice %63 {offsets = [0, 256], sizes = [8, 128], strides = [1, 1]} : vector<8x384xf32> to vector<8x128xf32>
    %67 = vector.extract_strided_slice %57 {offsets = [0, 384], sizes = [8, 128], strides = [1, 1]} : vector<8x512xf32> to vector<8x128xf32>
    %68 = math.tanh %67 : vector<8x128xf32>
    %69 = arith.mulf %65, %52 : vector<8x128xf32>
    %70 = arith.mulf %64, %68 : vector<8x128xf32>
    %71 = arith.addf %69, %70 : vector<8x128xf32>
    %72 = math.tanh %71 : vector<8x128xf32>
    %73 = arith.mulf %66, %72 : vector<8x128xf32>
    %c24 = arith.constant 24 : index
    %c0_28 = arith.constant 0 : index
    %74 = vector.load %arg7[%c24, %c0_28] : memref<64x512xf32, #tpu.memory_space<vmem>>, vector<8x512xf32>
    %cst_29 = arith.constant dense<0.000000e+00> : vector<8x512xf32>
    %75 = tpu.matmul %73, %6, %cst_29 {dimension_numbers = #tpu.dot_dimension_numbers<[1], [0], [0], [1], [0, 0, 1, 1], [], []>} : vector<8x128xf32>, vector<128x512xf32>, vector<8x512xf32> -> vector<8x512xf32>
    %76 = arith.addf %74, %75 : vector<8x512xf32>
    %77 = vector.extract_strided_slice %76 {offsets = [0, 0], sizes = [8, 384], strides = [1, 1]} : vector<8x512xf32> to vector<8x384xf32>
    %78 = arith.negf %77 : vector<8x384xf32>
    %79 = math.exp %78 : vector<8x384xf32>
    %cst_30 = arith.constant 1.000000e+00 : f32
    %80 = vector.broadcast %cst_30 : f32 to vector<8x384xf32>
    %81 = arith.addf %80, %79 : vector<8x384xf32>
    %82 = arith.divf %80, %81 : vector<8x384xf32>
    %83 = vector.extract_strided_slice %82 {offsets = [0, 0], sizes = [8, 128], strides = [1, 1]} : vector<8x384xf32> to vector<8x128xf32>
    %84 = vector.extract_strided_slice %82 {offsets = [0, 128], sizes = [8, 128], strides = [1, 1]} : vector<8x384xf32> to vector<8x128xf32>
    %85 = vector.extract_strided_slice %82 {offsets = [0, 256], sizes = [8, 128], strides = [1, 1]} : vector<8x384xf32> to vector<8x128xf32>
    %86 = vector.extract_strided_slice %76 {offsets = [0, 384], sizes = [8, 128], strides = [1, 1]} : vector<8x512xf32> to vector<8x128xf32>
    %87 = math.tanh %86 : vector<8x128xf32>
    %88 = arith.mulf %84, %71 : vector<8x128xf32>
    %89 = arith.mulf %83, %87 : vector<8x128xf32>
    %90 = arith.addf %88, %89 : vector<8x128xf32>
    %91 = math.tanh %90 : vector<8x128xf32>
    %92 = arith.mulf %85, %91 : vector<8x128xf32>
    %c32 = arith.constant 32 : index
    %c0_31 = arith.constant 0 : index
    %93 = vector.load %arg7[%c32, %c0_31] : memref<64x512xf32, #tpu.memory_space<vmem>>, vector<8x512xf32>
    %cst_32 = arith.constant dense<0.000000e+00> : vector<8x512xf32>
    %94 = tpu.matmul %92, %6, %cst_32 {dimension_numbers = #tpu.dot_dimension_numbers<[1], [0], [0], [1], [0, 0, 1, 1], [], []>} : vector<8x128xf32>, vector<128x512xf32>, vector<8x512xf32> -> vector<8x512xf32>
    %95 = arith.addf %93, %94 : vector<8x512xf32>
    %96 = vector.extract_strided_slice %95 {offsets = [0, 0], sizes = [8, 384], strides = [1, 1]} : vector<8x512xf32> to vector<8x384xf32>
    %97 = arith.negf %96 : vector<8x384xf32>
    %98 = math.exp %97 : vector<8x384xf32>
    %cst_33 = arith.constant 1.000000e+00 : f32
    %99 = vector.broadcast %cst_33 : f32 to vector<8x384xf32>
    %100 = arith.addf %99, %98 : vector<8x384xf32>
    %101 = arith.divf %99, %100 : vector<8x384xf32>
    %102 = vector.extract_strided_slice %101 {offsets = [0, 0], sizes = [8, 128], strides = [1, 1]} : vector<8x384xf32> to vector<8x128xf32>
    %103 = vector.extract_strided_slice %101 {offsets = [0, 128], sizes = [8, 128], strides = [1, 1]} : vector<8x384xf32> to vector<8x128xf32>
    %104 = vector.extract_strided_slice %101 {offsets = [0, 256], sizes = [8, 128], strides = [1, 1]} : vector<8x384xf32> to vector<8x128xf32>
    %105 = vector.extract_strided_slice %95 {offsets = [0, 384], sizes = [8, 128], strides = [1, 1]} : vector<8x512xf32> to vector<8x128xf32>
    %106 = math.tanh %105 : vector<8x128xf32>
    %107 = arith.mulf %103, %90 : vector<8x128xf32>
    %108 = arith.mulf %102, %106 : vector<8x128xf32>
    %109 = arith.addf %107, %108 : vector<8x128xf32>
    %110 = math.tanh %109 : vector<8x128xf32>
    %111 = arith.mulf %104, %110 : vector<8x128xf32>
    %c40 = arith.constant 40 : index
    %c0_34 = arith.constant 0 : index
    %112 = vector.load %arg7[%c40, %c0_34] : memref<64x512xf32, #tpu.memory_space<vmem>>, vector<8x512xf32>
    %cst_35 = arith.constant dense<0.000000e+00> : vector<8x512xf32>
    %113 = tpu.matmul %111, %6, %cst_35 {dimension_numbers = #tpu.dot_dimension_numbers<[1], [0], [0], [1], [0, 0, 1, 1], [], []>} : vector<8x128xf32>, vector<128x512xf32>, vector<8x512xf32> -> vector<8x512xf32>
    %114 = arith.addf %112, %113 : vector<8x512xf32>
    %115 = vector.extract_strided_slice %114 {offsets = [0, 0], sizes = [8, 384], strides = [1, 1]} : vector<8x512xf32> to vector<8x384xf32>
    %116 = arith.negf %115 : vector<8x384xf32>
    %117 = math.exp %116 : vector<8x384xf32>
    %cst_36 = arith.constant 1.000000e+00 : f32
    %118 = vector.broadcast %cst_36 : f32 to vector<8x384xf32>
    %119 = arith.addf %118, %117 : vector<8x384xf32>
    %120 = arith.divf %118, %119 : vector<8x384xf32>
    %121 = vector.extract_strided_slice %120 {offsets = [0, 0], sizes = [8, 128], strides = [1, 1]} : vector<8x384xf32> to vector<8x128xf32>
    %122 = vector.extract_strided_slice %120 {offsets = [0, 128], sizes = [8, 128], strides = [1, 1]} : vector<8x384xf32> to vector<8x128xf32>
    %123 = vector.extract_strided_slice %120 {offsets = [0, 256], sizes = [8, 128], strides = [1, 1]} : vector<8x384xf32> to vector<8x128xf32>
    %124 = vector.extract_strided_slice %114 {offsets = [0, 384], sizes = [8, 128], strides = [1, 1]} : vector<8x512xf32> to vector<8x128xf32>
    %125 = math.tanh %124 : vector<8x128xf32>
    %126 = arith.mulf %122, %109 : vector<8x128xf32>
    %127 = arith.mulf %121, %125 : vector<8x128xf32>
    %128 = arith.addf %126, %127 : vector<8x128xf32>
    %129 = math.tanh %128 : vector<8x128xf32>
    %130 = arith.mulf %123, %129 : vector<8x128xf32>
    %c48 = arith.constant 48 : index
    %c0_37 = arith.constant 0 : index
    %131 = vector.load %arg7[%c48, %c0_37] : memref<64x512xf32, #tpu.memory_space<vmem>>, vector<8x512xf32>
    %cst_38 = arith.constant dense<0.000000e+00> : vector<8x512xf32>
    %132 = tpu.matmul %130, %6, %cst_38 {dimension_numbers = #tpu.dot_dimension_numbers<[1], [0], [0], [1], [0, 0, 1, 1], [], []>} : vector<8x128xf32>, vector<128x512xf32>, vector<8x512xf32> -> vector<8x512xf32>
    %133 = arith.addf %131, %132 : vector<8x512xf32>
    %134 = vector.extract_strided_slice %133 {offsets = [0, 0], sizes = [8, 384], strides = [1, 1]} : vector<8x512xf32> to vector<8x384xf32>
    %135 = arith.negf %134 : vector<8x384xf32>
    %136 = math.exp %135 : vector<8x384xf32>
    %cst_39 = arith.constant 1.000000e+00 : f32
    %137 = vector.broadcast %cst_39 : f32 to vector<8x384xf32>
    %138 = arith.addf %137, %136 : vector<8x384xf32>
    %139 = arith.divf %137, %138 : vector<8x384xf32>
    %140 = vector.extract_strided_slice %139 {offsets = [0, 0], sizes = [8, 128], strides = [1, 1]} : vector<8x384xf32> to vector<8x128xf32>
    %141 = vector.extract_strided_slice %139 {offsets = [0, 128], sizes = [8, 128], strides = [1, 1]} : vector<8x384xf32> to vector<8x128xf32>
    %142 = vector.extract_strided_slice %139 {offsets = [0, 256], sizes = [8, 128], strides = [1, 1]} : vector<8x384xf32> to vector<8x128xf32>
    %143 = vector.extract_strided_slice %133 {offsets = [0, 384], sizes = [8, 128], strides = [1, 1]} : vector<8x512xf32> to vector<8x128xf32>
    %144 = math.tanh %143 : vector<8x128xf32>
    %145 = arith.mulf %141, %128 : vector<8x128xf32>
    %146 = arith.mulf %140, %144 : vector<8x128xf32>
    %147 = arith.addf %145, %146 : vector<8x128xf32>
    %148 = math.tanh %147 : vector<8x128xf32>
    %149 = arith.mulf %142, %148 : vector<8x128xf32>
    %c56 = arith.constant 56 : index
    %c0_40 = arith.constant 0 : index
    %150 = vector.load %arg7[%c56, %c0_40] : memref<64x512xf32, #tpu.memory_space<vmem>>, vector<8x512xf32>
    %cst_41 = arith.constant dense<0.000000e+00> : vector<8x512xf32>
    %151 = tpu.matmul %149, %6, %cst_41 {dimension_numbers = #tpu.dot_dimension_numbers<[1], [0], [0], [1], [0, 0, 1, 1], [], []>} : vector<8x128xf32>, vector<128x512xf32>, vector<8x512xf32> -> vector<8x512xf32>
    %152 = arith.addf %150, %151 : vector<8x512xf32>
    %153 = vector.extract_strided_slice %152 {offsets = [0, 0], sizes = [8, 384], strides = [1, 1]} : vector<8x512xf32> to vector<8x384xf32>
    %154 = arith.negf %153 : vector<8x384xf32>
    %155 = math.exp %154 : vector<8x384xf32>
    %cst_42 = arith.constant 1.000000e+00 : f32
    %156 = vector.broadcast %cst_42 : f32 to vector<8x384xf32>
    %157 = arith.addf %156, %155 : vector<8x384xf32>
    %158 = arith.divf %156, %157 : vector<8x384xf32>
    %159 = vector.extract_strided_slice %158 {offsets = [0, 0], sizes = [8, 128], strides = [1, 1]} : vector<8x384xf32> to vector<8x128xf32>
    %160 = vector.extract_strided_slice %158 {offsets = [0, 128], sizes = [8, 128], strides = [1, 1]} : vector<8x384xf32> to vector<8x128xf32>
    %161 = vector.extract_strided_slice %158 {offsets = [0, 256], sizes = [8, 128], strides = [1, 1]} : vector<8x384xf32> to vector<8x128xf32>
    %162 = vector.extract_strided_slice %152 {offsets = [0, 384], sizes = [8, 128], strides = [1, 1]} : vector<8x512xf32> to vector<8x128xf32>
    %163 = math.tanh %162 : vector<8x128xf32>
    %164 = arith.mulf %160, %147 : vector<8x128xf32>
    %165 = arith.mulf %159, %163 : vector<8x128xf32>
    %166 = arith.addf %164, %165 : vector<8x128xf32>
    %167 = math.tanh %166 : vector<8x128xf32>
    %168 = arith.mulf %161, %167 : vector<8x128xf32>
    %c0_43 = arith.constant 0 : index
    %c0_44 = arith.constant 0 : index
    %169 = vector.load %arg8[%c0_43, %c0_44] : memref<8x128xf32, #tpu.memory_space<vmem>>, vector<8x128xf32>
    tpu.vector_store %arg8[%c0_43, %c0_44], %168 {strides = array<i32>} : memref<8x128xf32, #tpu.memory_space<vmem>>, vector<8x128xf32>,
    %c0_45 = arith.constant 0 : index
    %c0_46 = arith.constant 0 : index
    %170 = vector.load %arg9[%c0_45, %c0_46] : memref<8x128xf32, #tpu.memory_space<vmem>>, vector<8x128xf32>
    tpu.vector_store %arg9[%c0_45, %c0_46], %166 {strides = array<i32>} : memref<8x128xf32, #tpu.memory_space<vmem>>, vector<8x128xf32>,
    %c0_47 = arith.constant 0 : index
    %c0_48 = arith.constant 0 : index
    %c0_49 = arith.constant 0 : index
    %171 = vector.load %arg6[%c0_47, %c0_48, %c0_49] : memref<1x8x128xf32, #tpu.memory_space<vmem>>, vector<1x8x128xf32>
    %172 = vector.shape_cast %171 : vector<1x8x128xf32> to vector<8x128xf32>
    %173 = vector.shape_cast %168 : vector<8x128xf32> to vector<1x8x128xf32>
    tpu.vector_store %arg6[%c0_47, %c0_48, %c0_49], %173 {strides = array<i32>} : memref<1x8x128xf32, #tpu.memory_space<vmem>>, vector<1x8x128xf32>,
    return
  }
  func.func @transform_0(%arg0: i32, %arg1: i32) -> (i32, i32, i32) {
    %c2_i32 = arith.constant 2 : i32
    %0 = arith.muli %c2_i32, %arg1 : i32
    %c0_i32 = arith.constant 0 : i32
    %1 = arith.subi %c0_i32, %0 : i32
    %2 = arith.muli %arg0, %1 : i32
    %3 = arith.addi %arg1, %2 : i32
    %c0_i32_0 = arith.constant 0 : i32
    %c0_i32_1 = arith.constant 0 : i32
    %c0_i32_2 = arith.constant 0 : i32
    return %3, %c0_i32_0, %c0_i32_1 : i32, i32, i32
  }
  func.func @transform_1(%arg0: i32, %arg1: i32) -> (i32, i32, i32) {
    %c0_i32 = arith.constant 0 : i32
    %c0_i32_0 = arith.constant 0 : i32
    %c0_i32_1 = arith.constant 0 : i32
    return %arg0, %c0_i32, %c0_i32_0 : i32, i32, i32
  }
  func.func @transform_2(%arg0: i32, %arg1: i32) -> (i32, i32, i32) {
    %c0_i32 = arith.constant 0 : i32
    %c0_i32_0 = arith.constant 0 : i32
    %c0_i32_1 = arith.constant 0 : i32
    return %arg0, %c0_i32, %c0_i32_0 : i32, i32, i32
  }
  func.func @transform_3(%arg0: i32, %arg1: i32) -> (i32, i32, i32) {
    %c0_i32 = arith.constant 0 : i32
    %c0_i32_0 = arith.constant 0 : i32
    %c0_i32_1 = arith.constant 0 : i32
    return %arg0, %c0_i32, %c0_i32_0 : i32, i32, i32
  }
  func.func @transform_4(%arg0: i32, %arg1: i32) -> (i32, i32, i32) {
    %c0_i32 = arith.constant 0 : i32
    %c0_i32_0 = arith.constant 0 : i32
    %c0_i32_1 = arith.constant 0 : i32
    return %arg0, %c0_i32, %c0_i32_0 : i32, i32, i32
  }
}

</mosaic_0001>

<bundles_post_ra>
// kernel: tpu_custom_call.1
= control target key start
LH: loop header
LB: loop body
LE: loop exit
PB: predicated region body
PF: predicated region fallthrough
CT: control target
= control target key end

     0   :  { %9 = vsyncpa [#allocation6], 0  ;;  %s2952_s0 = inlined_call_operand.vmem [shape: f32[1,64,16], index: 0, kind: input, shape index: {}]   ;;  %s2953_s1 = inlined_call_operand.vmem [shape: f32[1,16,512], index: 1, kind: input, shape index: {}]   ;;  %s2954_s2 = inlined_call_operand.hbm [shape: f32[1,128,512], index: 2, kind: input, shape index: {}]   ;;  %s2955_s3 = inlined_call_operand.vmem [shape: f32[1,1,512], index: 3, kind: input, shape index: {}]   ;;  %s2956_s4 = inlined_call_operand.hbm [shape: f32[1,8,128], index: 4, kind: output, shape index: {}]  }
   0x1   :  { %10 = vsyncpa [#allocation7], 0  ;;  %s32_s17 = sshll.u32 %s2954_s2, 4  ;;  %s1927_s18 = smov [#allocation5]   ;;  %s33_s17 = int_to_ptr.hbm [resolvable:$true] %s32_s17 }
   0x2   :  { %s34_s19 = sshll.u32 %s1927_s18, 4  ;;  %s1928_s20 = smov 512   ;;  %s35_s19 = int_to_ptr.vmem [resolvable:$true] %s34_s19 }
   0x3   :  { %s1929_s21 = smov 32  }
   0x4   :  { %40 = dma.hbm_to_vmem [thread:$0]  %s33_s17, 8192, %s35_s19, [#allocation6], %s1928_s20, %s1928_s20, %s1929_s21  }
   0x5   :  { %1923 = dma.done.wait [#allocation6], 8192  }
   0x6   :  { %1924 = vsyncadd [#allocation6], 4294959104  ;;  %v79_v0 = vld [vmem:[%s2953_s1 + $0x20] sm:$0xff]  ;;  %v80_v1 = vld [vmem:[%s2953_s1 + $0x28] sm:$0xff]  ;;  %vm165_vm0 = vcmask 130048   ;;  %s1606_s29 = sshll.u32 %s2956_s4, 4  ;;  %s1607_s29 = int_to_ptr.hbm [resolvable:$true] %s1606_s29 }
   0x7   :  { %v81_v2 = vld [vmem:[%s2953_s1 + $0x30] sm:$0xff]  ;;  %204 = vmatpush.msra.mxu0 %v79_v0  ;;  %245 = vmatpush.msra.mxu1 %v80_v1  ;;  %v82_v3 = vld [vmem:[%s2953_s1 + $0x38] sm:$0xff]  ;;  %v75_v4 = vld [vmem:[%s2953_s1] sm:$0xff] }
   0x8   :  { %v76_v5 = vld [vmem:[%s2953_s1 + $0x8] sm:$0xff]  ;;  %286 = vmatpush.msra.mxu2 %v81_v2  ;;  %327 = vmatpush.msra.mxu3 %v82_v3  ;;  %v77_v6 = vld [vmem:[%s2953_s1 + $0x10] sm:$0xff]  ;;  %v78_v7 = vld [vmem:[%s2953_s1 + $0x18] sm:$0xff] }
   0x9   :  { %v147_v8 = vld [vmem:[%s2952_s0] sm:$0xff]  ;;  %205 = vmatpush.msra.mxu0 %v75_v4  ;;  %246 = vmatpush.msra.mxu1 %v76_v5  ;;  %v1989_v10 = vld [vmem:[#allocation5 + $0x1e8] sm:$0xff]  ;;  %v1993_v11 = vld [vmem:[#allocation5 + $0x1f0] sm:$0xff] }
   0xa   :  { %287 = vmatpush.msra.mxu2 %v77_v6  ;;  %328 = vmatpush.msra.mxu3 %v78_v7  ;;  %v1987_v9 = vld [vmem:[#allocation5 + $0x1e0] sm:$0xff]  ;;  %v1999_v13 = vld [vmem:[#allocation5 + $0x1c8] sm:$0xff]  ;;  %v2003_v14 = vld [vmem:[#allocation5 + $0x1d0] sm:$0xff] }
   0xb   :  { %1622 = vmatmul.msk.f32.vlgmr.msra.gmra.mxu0 %vm165_vm0, %v147_v8  ;;  %1630 = vmatmul.msk.f32.vlgmr.msra.gmra.mxu1 %vm165_vm0, %v147_v8  ;;  %v1997_v12 = vld [vmem:[#allocation5 + $0x1c0] sm:$0xff]  ;;  %v2005_v15 = vld [vmem:[#allocation5 + $0x1f8] sm:$0xff]  ;;  %v2010_v17 = vld [vmem:[#allocation5 + $0x1a8] sm:$0xff] }
   0xc   :  { %1638 = vmatmul.msk.f32.vlgmr.msra.gmra.mxu2 %vm165_vm0, %v147_v8  ;;  %1646 = vmatmul.msk.f32.vlgmr.msra.gmra.mxu3 %vm165_vm0, %v147_v8  ;;  %v2008_v16 = vld [vmem:[#allocation5 + $0x1a0] sm:$0xff]  ;;  %v2013_v18 = vld [vmem:[#allocation5 + $0x1d8] sm:$0xff]  ;;  %v2017_v19 = vld [vmem:[#allocation5 + $0x1b0] sm:$0xff] }
   0xd   :  { %392 = vmatpush.msrb.mxu0 %v1987_v9  ;;  %412 = vmatpush.msrb.mxu1 %v1989_v10  ;;  %v148_v20 = vld [vmem:[%s2952_s0 + $0x8] sm:$0xff]  ;;  %v2024_v21 = vld [vmem:[#allocation5 + $0x1b8] sm:$0xff]  ;;  %v2028_v22 = vld [vmem:[#allocation5 + $0x180] sm:$0xff] }
   0xe   :  { %432 = vmatpush.msrb.mxu2 %v1993_v11  ;;  %452 = vmatpush.msrb.mxu3 %v2005_v15  ;;  %v2030_v23 = vld [vmem:[#allocation5 + $0x188] sm:$0xff]  ;;  %v2036_v24 = vld [vmem:[#allocation5 + $0x190] sm:$0xff]  ;;  %v2038_v25 = vld [vmem:[#allocation5 + $0x198] sm:$0xff] }
   0xf   :  { %393 = vmatpush.msrb.mxu0 %v1997_v12  ;;  %413 = vmatpush.msrb.mxu1 %v1999_v13  ;;  %v2042_v26 = vld [vmem:[#allocation5 + $0x160] sm:$0xff]  ;;  %v2044_v27 = vld [vmem:[#allocation5 + $0x168] sm:$0xff]  ;;  %v2048_v28 = vld [vmem:[#allocation5 + $0x170] sm:$0xff] }
  0x10   :  { %433 = vmatpush.msrb.mxu2 %v2003_v14  ;;  %453 = vmatpush.msrb.mxu3 %v2013_v18  ;;  %v2050_v29 = vld [vmem:[#allocation5 + $0x178] sm:$0xff]  ;;  %v2053_v30 = vld [vmem:[#allocation5 + $0x140] sm:$0xff]  ;;  %v2055_v31 = vld [vmem:[#allocation5 + $0x148] sm:$0xff] }
  0x11   :  { %394 = vmatpush.msrb.mxu0 %v2008_v16  ;;  %414 = vmatpush.msrb.mxu1 %v2010_v17  ;;  %v2060_v32 = vld [vmem:[#allocation5 + $0x150] sm:$0xff]  ;;  %v2062_v33 = vld [vmem:[#allocation5 + $0x158] sm:$0xff]  ;;  %v2071_v35 = vld [vmem:[#allocation5 + $0x120] sm:$0xff] }
  0x12   :  { %434 = vmatpush.msrb.mxu2 %v2017_v19  ;;  %454 = vmatpush.msrb.mxu3 %v2024_v21  ;;  %v149_v34 = vld [vmem:[%s2952_s0 + $0x10] sm:$0xff]  ;;  %v2073_v36 = vld [vmem:[#allocation5 + $0x128] sm:$0xff]  ;;  %v2081_v38 = vld [vmem:[#allocation5 + $0x138] sm:$0xff] }
  0x13   :  { %1623 = vmatmul.msk.f32.gmra.mxu0 %vm165_vm0, %v148_v20  ;;  %1631 = vmatmul.msk.f32.gmra.mxu1 %vm165_vm0, %v148_v20  ;;  %v2079_v37 = vld [vmem:[#allocation5 + $0x130] sm:$0xff]  ;;  %v2085_v39 = vld [vmem:[#allocation5 + $0x100] sm:$0xff]  ;;  %v2087_v40 = vld [vmem:[#allocation5 + $0x108] sm:$0xff] }
  0x14   :  { %1639 = vmatmul.msk.f32.gmra.mxu2 %vm165_vm0, %v148_v20  ;;  %1647 = vmatmul.msk.f32.gmra.mxu3 %vm165_vm0, %v148_v20  ;;  %v2091_v41 = vld [vmem:[#allocation5 + $0x110] sm:$0xff]  ;;  %v2093_v42 = vld [vmem:[#allocation5 + $0x118] sm:$0xff]  ;;  %v2096_v43 = vld [vmem:[#allocation5 + $0xe0] sm:$0xff] }
  0x15   :  { %395 = vmatpush.msrb.mxu0 %v2028_v22  ;;  %415 = vmatpush.msrb.mxu1 %v2030_v23  ;;  %v2098_v44 = vld [vmem:[#allocation5 + $0xe8] sm:$0xff]  ;;  %v2103_v45 = vld [vmem:[#allocation5 + $0xf0] sm:$0xff]  ;;  %v2105_v46 = vld [vmem:[#allocation5 + $0xf8] sm:$0xff] }
  0x16   :  { %435 = vmatpush.msrb.mxu2 %v2036_v24  ;;  %455 = vmatpush.msrb.mxu3 %v2038_v25  ;;  %v150_v47 = vld [vmem:[%s2952_s0 + $0x18] sm:$0xff]  ;;  %v2114_v48 = vld [vmem:[#allocation5 + $0xc0] sm:$0xff]  ;;  %v2116_v49 = vld [vmem:[#allocation5 + $0xc8] sm:$0xff] }
  0x17   :  { %396 = vmatpush.msrb.mxu0 %v2042_v26  ;;  %416 = vmatpush.msrb.mxu1 %v2044_v27  ;;  %v2122_v50 = vld [vmem:[#allocation5 + $0xd0] sm:$0xff]  ;;  %v2124_v51 = vld [vmem:[#allocation5 + $0xd8] sm:$0xff]  ;;  %v2128_v52 = vld [vmem:[#allocation5 + $0xa0] sm:$0xff] }
  0x18   :  { %436 = vmatpush.msrb.mxu2 %v2048_v28  ;;  %456 = vmatpush.msrb.mxu3 %v2050_v29  ;;  %3044 = vst [vmem:[#allocation11_spill] sm:$0xff] %v2122_v50  ;;  %v2130_v53 = vld [vmem:[#allocation5 + $0xa8] sm:$0xff]  ;;  %v2134_v54 = vld [vmem:[#allocation5 + $0xb0] sm:$0xff]  ;;  %v2136_v55 = vld [vmem:[#allocation5 + $0xb8] sm:$0xff] }
  0x19   :  { %397 = vmatpush.msrb.mxu0 %v2053_v30  ;;  %417 = vmatpush.msrb.mxu1 %v2055_v31  ;;  %3045 = vst [vmem:[#allocation12_spill] sm:$0xff] %v2124_v51  ;;  %v2139_v56 = vld [vmem:[#allocation5 + $0x80] sm:$0xff]  ;;  %v2141_v57 = vld [vmem:[#allocation5 + $0x88] sm:$0xff]  ;;  %v2146_v58 = vld [vmem:[#allocation5 + $0x90] sm:$0xff] }
  0x1a   :  { %437 = vmatpush.msrb.mxu2 %v2060_v32  ;;  %457 = vmatpush.msrb.mxu3 %v2062_v33  ;;  %3046 = vst [vmem:[#allocation13_spill] sm:$0xff] %v2128_v52  ;;  %v2148_v59 = vld [vmem:[#allocation5 + $0x98] sm:$0xff]  ;;  %v151_v60 = vld [vmem:[%s2952_s0 + $0x20] sm:$0xff]  ;;  %v2159_v62 = vld [vmem:[#allocation5 + $0x68] sm:$0xff] }
  0x1b   :  { %1624 = vmatmul.msk.f32.gmra.mxu0 %vm165_vm0, %v149_v34  ;;  %1632 = vmatmul.msk.f32.gmra.mxu1 %vm165_vm0, %v149_v34  ;;  %3047 = vst [vmem:[#allocation14_spill] sm:$0xff] %v2130_v53  ;;  %v2157_v61 = vld [vmem:[#allocation5 + $0x60] sm:$0xff]  ;;  %v2165_v63 = vld [vmem:[#allocation5 + $0x70] sm:$0xff]  ;;  %v2167_v0 = vld [vmem:[#allocation5 + $0x78] sm:$0xff] }
  0x1c   :  { %1640 = vmatmul.msk.f32.gmra.mxu2 %vm165_vm0, %v149_v34  ;;  %1648 = vmatmul.msk.f32.gmra.mxu3 %vm165_vm0, %v149_v34  ;;  %3048 = vst [vmem:[#allocation15_spill] sm:$0xff] %v2134_v54  ;;  %v2171_v1 = vld [vmem:[#allocation5 + $0x40] sm:$0xff]  ;;  %v2173_v2 = vld [vmem:[#allocation5 + $0x48] sm:$0xff]  ;;  %v2177_v3 = vld [vmem:[#allocation5 + $0x50] sm:$0xff] }
  0x1d   :  { %398 = vmatpush.msrb.mxu0 %v2071_v35  ;;  %418 = vmatpush.msrb.mxu1 %v2073_v36  ;;  %3049 = vst [vmem:[#allocation16_spill] sm:$0xff] %v2136_v55  ;;  %v2179_v4 = vld [vmem:[#allocation5 + $0x58] sm:$0xff]  ;;  %v2182_v5 = vld [vmem:[#allocation5 + $0x20] sm:$0xff]  ;;  %v2184_v6 = vld [vmem:[#allocation5 + $0x28] sm:$0xff] }
  0x1e   :  { %438 = vmatpush.msrb.mxu2 %v2079_v37  ;;  %458 = vmatpush.msrb.mxu3 %v2081_v38  ;;  %3050 = vst [vmem:[#allocation17_spill] sm:$0xff] %v2139_v56  ;;  %v2189_v7 = vld [vmem:[#allocation5 + $0x30] sm:$0xff]  ;;  %v2191_v8 = vld [vmem:[#allocation5 + $0x38] sm:$0xff]  ;;  %v152_v20 = vld [vmem:[%s2952_s0 + $0x28] sm:$0xff] }
  0x1f   :  { %399 = vmatpush.msrb.mxu0 %v2085_v39  ;;  %419 = vmatpush.msrb.mxu1 %v2087_v40  ;;  %3051 = vst [vmem:[#allocation18_spill] sm:$0xff] %v2141_v57  ;;  %v2200_v34 = vld [vmem:[#allocation5] sm:$0xff] }
  0x20   :  { %439 = vmatpush.msrb.mxu2 %v2091_v41  ;;  %459 = vmatpush.msrb.mxu3 %v2093_v42  ;;  %3052 = vst [vmem:[#allocation19_spill] sm:$0xff] %v2146_v58 }
  0x21   :  { %400 = vmatpush.msrb.mxu0 %v2096_v43  ;;  %420 = vmatpush.msrb.mxu1 %v2098_v44  ;;  %3053 = vst [vmem:[#allocation20_spill] sm:$0xff] %v2148_v59 }
  0x22   :  { %440 = vmatpush.msrb.mxu2 %v2103_v45  ;;  %460 = vmatpush.msrb.mxu3 %v2105_v46  ;;  %3054 = vst [vmem:[#allocation21_spill] sm:$0xff] %v2157_v61 }
  0x23   :  { %1625 = vmatmul.msk.f32.gmra.mxu0 %vm165_vm0, %v150_v47  ;;  %1633 = vmatmul.msk.f32.gmra.mxu1 %vm165_vm0, %v150_v47  ;;  %3055 = vst [vmem:[#allocation22_spill] sm:$0xff] %v2159_v62 }
  0x24   :  { %1641 = vmatmul.msk.f32.gmra.mxu2 %vm165_vm0, %v150_v47  ;;  %1649 = vmatmul.msk.f32.gmra.mxu3 %vm165_vm0, %v150_v47  ;;  %3056 = vst [vmem:[#allocation23_spill] sm:$0xff] %v2165_v63  ;;  %v2202_v47 = vld [vmem:[#allocation5 + $0x8] sm:$0xff] }
  0x25   :  { %401 = vmatpush.msrb.mxu0 %v2114_v48  ;;  %421 = vmatpush.msrb.mxu1 %v2116_v49  ;;  %3057 = vst [vmem:[#allocation24_spill] sm:$0xff] %v2167_v0 }
  0x26   :  { %441 = vmatpush.msrb.mxu2 %v2122_v50  ;;  %461 = vmatpush.msrb.mxu3 %v2124_v51  ;;  %3058 = vst [vmem:[#allocation25_spill] sm:$0xff] %v2171_v1 }
  0x27   :  { %402 = vmatpush.msrb.mxu0 %v2128_v52  ;;  %422 = vmatpush.msrb.mxu1 %v2130_v53  ;;  %3059 = vst [vmem:[#allocation26_spill] sm:$0xff] %v2173_v2 }
  0x28   :  { %442 = vmatpush.msrb.mxu2 %v2134_v54  ;;  %462 = vmatpush.msrb.mxu3 %v2136_v55  ;;  %3060 = vst [vmem:[#allocation27_spill] sm:$0xff] %v2177_v3 }
  0x29   :  { %403 = vmatpush.msrb.mxu0 %v2139_v56  ;;  %423 = vmatpush.msrb.mxu1 %v2141_v57  ;;  %3061 = vst [vmem:[#allocation28_spill] sm:$0xff] %v2179_v4 }
  0x2a   :  { %443 = vmatpush.msrb.mxu2 %v2146_v58  ;;  %463 = vmatpush.msrb.mxu3 %v2148_v59  ;;  %3062 = vst [vmem:[#allocation29_spill] sm:$0xff] %v2182_v5 }
  0x2b   :  { %1626 = vmatmul.msk.f32.gmra.mxu0 %vm165_vm0, %v151_v60  ;;  %1634 = vmatmul.msk.f32.gmra.mxu1 %vm165_vm0, %v151_v60  ;;  %3063 = vst [vmem:[#allocation30_spill] sm:$0xff] %v2184_v6 }
  0x2c   :  { %1642 = vmatmul.msk.f32.gmra.mxu2 %vm165_vm0, %v151_v60  ;;  %1650 = vmatmul.msk.f32.gmra.mxu3 %vm165_vm0, %v151_v60  ;;  %3064 = vst [vmem:[#allocation31_spill] sm:$0xff] %v2189_v7  ;;  %v2208_v60 = vld [vmem:[#allocation5 + $0x10] sm:$0xff] }
  0x2d   :  { %404 = vmatpush.msrb.mxu0 %v2157_v61  ;;  %424 = vmatpush.msrb.mxu1 %v2159_v62  ;;  %3065 = vst [vmem:[#allocation32_spill] sm:$0xff] %v2191_v8 }
  0x2e   :  { %444 = vmatpush.msrb.mxu2 %v2165_v63  ;;  %464 = vmatpush.msrb.mxu3 %v2167_v0  ;;  %3066 = vst [vmem:[#allocation33_spill] sm:$0xff] %v2200_v34 }
  0x2f   :  { %405 = vmatpush.msrb.mxu0 %v2171_v1  ;;  %425 = vmatpush.msrb.mxu1 %v2173_v2  ;;  %3067 = vst [vmem:[#allocation34_spill] sm:$0xff] %v2202_v47 }
  0x30   :  { %445 = vmatpush.msrb.mxu2 %v2177_v3  ;;  %465 = vmatpush.msrb.mxu3 %v2179_v4  ;;  %3068 = vst [vmem:[#allocation35_spill] sm:$0xff] %v2208_v60  ;;  %v2210_v3 = vld [vmem:[#allocation5 + $0x18] sm:$0xff] }
  0x31   :  { %406 = vmatpush.msrb.mxu0 %v2182_v5  ;;  %426 = vmatpush.msrb.mxu1 %v2184_v6  ;;  %3069 = vst [vmem:[#allocation36_spill] sm:$0xff] %v2210_v3 }
  0x32   :  { %446 = vmatpush.msrb.mxu2 %v2189_v7  ;;  %466 = vmatpush.msrb.mxu3 %v2191_v8  ;;  %v153_v8 = vld [vmem:[%s2952_s0 + $0x30] sm:$0xff] }
  0x33   :  { %1627 = vmatmul.msk.f32.gmra.mxu0 %vm165_vm0, %v152_v20  ;;  %1635 = vmatmul.msk.f32.gmra.mxu1 %vm165_vm0, %v152_v20 }
  0x34   :  { %1643 = vmatmul.msk.f32.gmra.mxu2 %vm165_vm0, %v152_v20  ;;  %1651 = vmatmul.msk.f32.gmra.mxu3 %vm165_vm0, %v152_v20  ;;  %v154_v20 = vld [vmem:[%s2952_s0 + $0x38] sm:$0xff] }
  0x35   :  { %407 = vmatpush.msrb.mxu0 %v2200_v34  ;;  %427 = vmatpush.msrb.mxu1 %v2202_v47 }
  0x36   :  { %447 = vmatpush.msrb.mxu2 %v2208_v60  ;;  %467 = vmatpush.msrb.mxu3 %v2210_v3 }
  0x37   :  { %543 = vmatpush.msra.mxu0 %v1987_v9  ;;  %563 = vmatpush.msra.mxu1 %v1989_v10 }
  0x38   :  { %583 = vmatpush.msra.mxu2 %v1993_v11  ;;  %603 = vmatpush.msra.mxu3 %v2005_v15 }
  0x39   :  { %544 = vmatpush.msra.mxu0 %v1997_v12  ;;  %564 = vmatpush.msra.mxu1 %v1999_v13 }
  0x3a   :  { %584 = vmatpush.msra.mxu2 %v2003_v14  ;;  %604 = vmatpush.msra.mxu3 %v2013_v18 }
  0x3b   :  { %1628 = vmatmul.msk.f32.gmra.mxu0 %vm165_vm0, %v153_v8  ;;  %1636 = vmatmul.msk.f32.gmra.mxu1 %vm165_vm0, %v153_v8 }
  0x3c   :  { %1644 = vmatmul.msk.f32.gmra.mxu2 %vm165_vm0, %v153_v8  ;;  %1652 = vmatmul.msk.f32.gmra.mxu3 %vm165_vm0, %v153_v8  ;;  %v1930_v8 = vmov 0.0  }
  0x3d   :  { %545 = vmatpush.msra.mxu0 %v2008_v16  ;;  %565 = vmatpush.msra.mxu1 %v2010_v17 }
  0x3e   :  { %585 = vmatpush.msra.mxu2 %v2017_v19  ;;  %605 = vmatpush.msra.mxu3 %v2024_v21 }
  0x3f   :  { %546 = vmatpush.msra.mxu0 %v2028_v22  ;;  %566 = vmatpush.msra.mxu1 %v2030_v23 }
  0x40   :  { %586 = vmatpush.msra.mxu2 %v2036_v24  ;;  %606 = vmatpush.msra.mxu3 %v2038_v25 }
  0x41   :  { %547 = vmatpush.msra.mxu0 %v2042_v26  ;;  %567 = vmatpush.msra.mxu1 %v2044_v27 }
  0x42   :  { %587 = vmatpush.msra.mxu2 %v2048_v28  ;;  %607 = vmatpush.msra.mxu3 %v2050_v29 }
  0x43   :  { %1629 = vmatmul.msk.f32.gmra.mxu0 %vm165_vm0, %v154_v20  ;;  %1637 = vmatmul.msk.f32.gmra.mxu1 %vm165_vm0, %v154_v20 }
  0x44   :  { %1645 = vmatmul.msk.f32.gmra.mxu2 %vm165_vm0, %v154_v20  ;;  %1653 = vmatmul.msk.f32.gmra.mxu3 %vm165_vm0, %v154_v20  ;;  %v3070_v20 = vld [vmem:[#allocation27_spill] sm:$0xff] }
  0x45   :  { %548 = vmatpush.msra.mxu0 %v2053_v30  ;;  %568 = vmatpush.msra.mxu1 %v2055_v31 }
  0x46   :  { %588 = vmatpush.msra.mxu2 %v2060_v32  ;;  %608 = vmatpush.msra.mxu3 %v2062_v33 }
  0x47   :  { %549 = vmatpush.msra.mxu0 %v2071_v35  ;;  %569 = vmatpush.msra.mxu1 %v2073_v36 }
  0x48   :  { %589 = vmatpush.msra.mxu2 %v2079_v37  ;;  %609 = vmatpush.msra.mxu3 %v2081_v38 }
  0x49   :  { %550 = vmatpush.msra.mxu0 %v2085_v39  ;;  %570 = vmatpush.msra.mxu1 %v2087_v40 }
  0x4a   :  { %590 = vmatpush.msra.mxu2 %v2091_v41  ;;  %610 = vmatpush.msra.mxu3 %v2093_v42 }
  0x4b   :  { %408 = vmatmul.f32.vlgmr.msrb.gmra.mxu0 %v1930_v8  ;;  %428 = vmatmul.f32.vlgmr.msrb.gmra.mxu1 %v1930_v8 }
  0x4c   :  { %448 = vmatmul.f32.vlgmr.msrb.gmra.mxu2 %v1930_v8  ;;  %468 = vmatmul.f32.vlgmr.msrb.gmra.mxu3 %v1930_v8  ;;  %v3071_v8 = vld [vmem:[#allocation32_spill] sm:$0xff] }
  0x4d   :  { %551 = vmatpush.msra.mxu0 %v2096_v43  ;;  %571 = vmatpush.msra.mxu1 %v2098_v44 }
  0x4e   :  { %591 = vmatpush.msra.mxu2 %v2103_v45  ;;  %611 = vmatpush.msra.mxu3 %v2105_v46 }
  0x4f   :  { %552 = vmatpush.msra.mxu0 %v2114_v48  ;;  %572 = vmatpush.msra.mxu1 %v2116_v49 }
  0x50   :  { %592 = vmatpush.msra.mxu2 %v2122_v50  ;;  %612 = vmatpush.msra.mxu3 %v2124_v51 }
  0x51   :  { %553 = vmatpush.msra.mxu0 %v2128_v52  ;;  %573 = vmatpush.msra.mxu1 %v2130_v53 }
  0x52   :  { %593 = vmatpush.msra.mxu2 %v2134_v54  ;;  %613 = vmatpush.msra.mxu3 %v2136_v55 }
  0x53   :  { %554 = vmatpush.msra.mxu0 %v2139_v56  ;;  %574 = vmatpush.msra.mxu1 %v2141_v57 }
  0x54   :  { %594 = vmatpush.msra.mxu2 %v2146_v58  ;;  %614 = vmatpush.msra.mxu3 %v2148_v59 }
  0x55   :  { %555 = vmatpush.msra.mxu0 %v2157_v61  ;;  %575 = vmatpush.msra.mxu1 %v2159_v62 }
  0x56   :  { %595 = vmatpush.msra.mxu2 %v2165_v63  ;;  %615 = vmatpush.msra.mxu3 %v2167_v0 }
  0x57   :  { %556 = vmatpush.msra.mxu0 %v2171_v1  ;;  %576 = vmatpush.msra.mxu1 %v2173_v2 }
  0x58   :  { %596 = vmatpush.msra.mxu2 %v3070_v20  ;;  %616 = vmatpush.msra.mxu3 %v2179_v4 }
  0x59   :  { %557 = vmatpush.msra.mxu0 %v2182_v5  ;;  %577 = vmatpush.msra.mxu1 %v2184_v6 }
  0x5a   :  { %597 = vmatpush.msra.mxu2 %v2189_v7  ;;  %617 = vmatpush.msra.mxu3 %v3071_v8 }
  0x5b   :  { %558 = vmatpush.msra.mxu0 %v2200_v34  ;;  %578 = vmatpush.msra.mxu1 %v2202_v47 }
  0x5c   :  { %598 = vmatpush.msra.mxu2 %v2208_v60  ;;  %618 = vmatpush.msra.mxu3 %v2210_v3 }
  0x5d   :  { %694 = vmatpush.msrb.mxu0 %v1987_v9  ;;  %714 = vmatpush.msrb.mxu1 %v1989_v10 }
  0x5e   :  { %734 = vmatpush.msrb.mxu2 %v1993_v11  ;;  %754 = vmatpush.msrb.mxu3 %v2005_v15 }
  0x5f   :  { %695 = vmatpush.msrb.mxu0 %v1997_v12  ;;  %715 = vmatpush.msrb.mxu1 %v1999_v13 }
  0x60   :  { %735 = vmatpush.msrb.mxu2 %v2003_v14  ;;  %755 = vmatpush.msrb.mxu3 %v2013_v18 }
  0x61   :  { %696 = vmatpush.msrb.mxu0 %v2008_v16  ;;  %716 = vmatpush.msrb.mxu1 %v2010_v17 }
  0x62   :  { %736 = vmatpush.msrb.mxu2 %v2017_v19  ;;  %756 = vmatpush.msrb.mxu3 %v2024_v21 }
  0x63   :  { %697 = vmatpush.msrb.mxu0 %v2028_v22  ;;  %717 = vmatpush.msrb.mxu1 %v2030_v23 }
  0x64   :  { %737 = vmatpush.msrb.mxu2 %v2036_v24  ;;  %757 = vmatpush.msrb.mxu3 %v2038_v25 }
  0x65   :  { %698 = vmatpush.msrb.mxu0 %v2042_v26  ;;  %718 = vmatpush.msrb.mxu1 %v2044_v27 }
  0x66   :  { %738 = vmatpush.msrb.mxu2 %v2048_v28  ;;  %758 = vmatpush.msrb.mxu3 %v2050_v29 }
  0x67   :  { %699 = vmatpush.msrb.mxu0 %v2053_v30  ;;  %719 = vmatpush.msrb.mxu1 %v2055_v31 }
  0x68   :  { %739 = vmatpush.msrb.mxu2 %v2060_v32  ;;  %759 = vmatpush.msrb.mxu3 %v2062_v33 }
  0x69   :  { %700 = vmatpush.msrb.mxu0 %v2071_v35  ;;  %720 = vmatpush.msrb.mxu1 %v2073_v36 }
  0x6a   :  { %740 = vmatpush.msrb.mxu2 %v2079_v37  ;;  %760 = vmatpush.msrb.mxu3 %v2081_v38 }
  0x6b   :  { %701 = vmatpush.msrb.mxu0 %v2085_v39  ;;  %721 = vmatpush.msrb.mxu1 %v2087_v40 }
  0x6c   :  { %741 = vmatpush.msrb.mxu2 %v2091_v41  ;;  %761 = vmatpush.msrb.mxu3 %v2093_v42 }
  0x6d   :  { %702 = vmatpush.msrb.mxu0 %v2096_v43  ;;  %722 = vmatpush.msrb.mxu1 %v2098_v44 }
  0x6e   :  { %742 = vmatpush.msrb.mxu2 %v2103_v45  ;;  %762 = vmatpush.msrb.mxu3 %v2105_v46 }
  0x6f   :  { %703 = vmatpush.msrb.mxu0 %v2114_v48  ;;  %723 = vmatpush.msrb.mxu1 %v2116_v49 }
  0x70   :  { %743 = vmatpush.msrb.mxu2 %v2122_v50  ;;  %763 = vmatpush.msrb.mxu3 %v2124_v51 }
  0x71   :  { %704 = vmatpush.msrb.mxu0 %v2128_v52  ;;  %724 = vmatpush.msrb.mxu1 %v2130_v53 }
  0x72   :  { %744 = vmatpush.msrb.mxu2 %v2134_v54  ;;  %764 = vmatpush.msrb.mxu3 %v2136_v55 }
  0x73   :  { %705 = vmatpush.msrb.mxu0 %v2139_v56  ;;  %725 = vmatpush.msrb.mxu1 %v2141_v57 }
  0x74   :  { %745 = vmatpush.msrb.mxu2 %v2146_v58  ;;  %765 = vmatpush.msrb.mxu3 %v2148_v59 }
  0x75   :  { %706 = vmatpush.msrb.mxu0 %v2157_v61  ;;  %726 = vmatpush.msrb.mxu1 %v2159_v62 }
  0x76   :  { %746 = vmatpush.msrb.mxu2 %v2165_v63  ;;  %766 = vmatpush.msrb.mxu3 %v2167_v0 }
  0x77   :  { %707 = vmatpush.msrb.mxu0 %v2171_v1  ;;  %727 = vmatpush.msrb.mxu1 %v2173_v2 }
  0x78   :  { %747 = vmatpush.msrb.mxu2 %v3070_v20  ;;  %767 = vmatpush.msrb.mxu3 %v2179_v4 }
  0x79   :  { %708 = vmatpush.msrb.mxu0 %v2182_v5  ;;  %728 = vmatpush.msrb.mxu1 %v2184_v6  ;;  %v155_v5 = vld [vmem:[%s2955_s3] sm:$0xf]  ;;  %s1931_s3 = smov [#allocation8]  }
  0x7a   :  { %748 = vmatpush.msrb.mxu2 %v2189_v7  ;;  %768 = vmatpush.msrb.mxu3 %v3071_v8  ;;  %v157_v4 = vperm.slane %v155_v5, 0  ;;  %v158_v6 = vperm.slane %v155_v5, 1  ;;  %s1604_s27 = sshll.u32 %s1931_s3, 4  ;;  %s1605_s27 = int_to_ptr.vmem [resolvable:$true] %s1604_s27 }
  0x7b   :  { %709 = vmatpush.msrb.mxu0 %v2200_v34  ;;  %729 = vmatpush.msrb.mxu1 %v2202_v47 }
  0x7c   :  { %749 = vmatpush.msrb.mxu2 %v2208_v60  ;;  %769 = vmatpush.msrb.mxu3 %v2210_v3  ;;  %v2371_v60 = vperm.slane %v155_v5, 2  ;;  %v2373_v3 = vperm.slane %v155_v5, 3 }
  0x88   :  { %v207_v2 = vpop.f32.mrf.mxu0  ;;  %v248_v20 = vpop.f32.mrf.mxu1 }
  0x8f   :  { %v2363_v1 = vpop.f32.mrf.mxu2  ;;  %v2365_v7 = vpop.f32.mrf.mxu3 }
  0x90   :  { %v210_v8 = vpop.f32.mrf.mxu0  ;;  %v251_v34 = vpop.f32.mrf.mxu1 }
  0x91   :  { %v2367_v0 = vadd.f32 %v210_v8, %v157_v4  ;;  %v2369_v47 = vadd.f32 %v251_v34, %v158_v6 }
  0x93   :  { %3072 = vst [vmem:[#allocation37_spill] sm:$0xff] %v2367_v0 }
  0x94   :  { %3073 = vst [vmem:[#allocation38_spill] sm:$0xff] %v2369_v47 }
  0x97   :  { %v292_v63 = vpop.f32.mrf.mxu2  ;;  %v333_v62 = vpop.f32.mrf.mxu3 }
  0x98   :  { %v2376_v61 = vadd.f32 %v292_v63, %v2371_v60  ;;  %v2379_v59 = vadd.f32 %v333_v62, %v2373_v3  ;;  %v213_v58 = vpop.f32.mrf.mxu0  ;;  %v254_v57 = vpop.f32.mrf.mxu1 }
  0x99   :  { %v2381_v56 = vadd.f32 %v213_v58, %v157_v4  ;;  %v2383_v8 = vadd.f32 %v254_v57, %v158_v6 }
  0x9a   :  { %3074 = vst [vmem:[#allocation39_spill] sm:$0xff] %v2376_v61 }
  0x9b   :  { %3075 = vst [vmem:[#allocation40_spill] sm:$0xff] %v2379_v59 }
  0x9c   :  { %3076 = vst [vmem:[#allocation41_spill] sm:$0xff] %v2381_v56 }
  0x9d   :  { %3077 = vst [vmem:[#allocation42_spill] sm:$0xff] %v2383_v8 }
  0x9f   :  { %v295_v34 = vpop.f32.mrf.mxu2  ;;  %v336_v47 = vpop.f32.mrf.mxu3 }
  0xa0   :  { %v2386_v0 = vadd.f32 %v295_v34, %v2371_v60  ;;  %v2389_v5 = vadd.f32 %v336_v47, %v2373_v3  ;;  %v216_v55 = vpop.f32.mrf.mxu0  ;;  %v257_v63 = vpop.f32.mrf.mxu1 }
  0xa1   :  { %v2391_v61 = vadd.f32 %v216_v55, %v157_v4  ;;  %v2393_v62 = vadd.f32 %v257_v63, %v158_v6 }
  0xa2   :  { %3078 = vst [vmem:[#allocation43_spill] sm:$0xff] %v2386_v0 }
  0xa3   :  { %3079 = vst [vmem:[#allocation44_spill] sm:$0xff] %v2389_v5 }
  0xa4   :  { %3080 = vst [vmem:[#allocation45_spill] sm:$0xff] %v2391_v61 }
  0xa5   :  { %3081 = vst [vmem:[#allocation46_spill] sm:$0xff] %v2393_v62 }
  0xa7   :  { %v298_v59 = vpop.f32.mrf.mxu2  ;;  %v339_v54 = vpop.f32.mrf.mxu3 }
  0xa8   :  { %v2396_v58 = vadd.f32 %v298_v59, %v2371_v60  ;;  %v2399_v57 = vadd.f32 %v339_v54, %v2373_v3  ;;  %v219_v8 = vpop.f32.mrf.mxu0  ;;  %v260_v34 = vpop.f32.mrf.mxu1 }
  0xa9   :  { %v2401_v0 = vadd.f32 %v219_v8, %v157_v4  ;;  %v2403_v47 = vadd.f32 %v260_v34, %v158_v6 }
  0xaa   :  { %3082 = vst [vmem:[#allocation47_spill] sm:$0xff] %v2396_v58 }
  0xab   :  { %3083 = vst [vmem:[#allocation48_spill] sm:$0xff] %v2399_v57 }
  0xac   :  { %3084 = vst [vmem:[#allocation49_spill] sm:$0xff] %v2401_v0 }
  0xad   :  { %3085 = vst [vmem:[#allocation50_spill] sm:$0xff] %v2403_v47 }
  0xaf   :  { %v301_v5 = vpop.f32.mrf.mxu2  ;;  %v342_v56 = vpop.f32.mrf.mxu3 }
  0xb0   :  { %v2406_v55 = vadd.f32 %v301_v5, %v2371_v60  ;;  %v2409_v63 = vadd.f32 %v342_v56, %v2373_v3  ;;  %v222_v62 = vpop.f32.mrf.mxu0  ;;  %v263_v59 = vpop.f32.mrf.mxu1 }
  0xb1   :  { %v2411_v58 = vadd.f32 %v222_v62, %v157_v4  ;;  %v2413_v54 = vadd.f32 %v263_v59, %v158_v6 }
  0xb2   :  { %3086 = vst [vmem:[#allocation51_spill] sm:$0xff] %v2406_v55 }
  0xb3   :  { %3087 = vst [vmem:[#allocation52_spill] sm:$0xff] %v2409_v63 }
  0xb4   :  { %3088 = vst [vmem:[#allocation53_spill] sm:$0xff] %v2411_v58  ;;  %v249_v58 = vadd.f32 %v248_v20, %v158_v6 }
  0xb5   :  { %3089 = vst [vmem:[#allocation54_spill] sm:$0xff] %v2413_v54 }
  0xb7   :  { %v304_v57 = vpop.f32.mrf.mxu2  ;;  %v345_v61 = vpop.f32.mrf.mxu3 }
  0xb8   :  { %v2416_v8 = vadd.f32 %v304_v57, %v2371_v60  ;;  %v2419_v34 = vadd.f32 %v345_v61, %v2373_v3  ;;  %v225_v47 = vpop.f32.mrf.mxu0  ;;  %v266_v5 = vpop.f32.mrf.mxu1 }
  0xb9   :  { %v2421_v55 = vadd.f32 %v225_v47, %v157_v4  ;;  %v2423_v56 = vadd.f32 %v266_v5, %v158_v6 }
  0xba   :  { %3090 = vst [vmem:[#allocation55_spill] sm:$0xff] %v2416_v8 }
  0xbb   :  { %3091 = vst [vmem:[#allocation56_spill] sm:$0xff] %v2419_v34  ;;  %v208_v34 = vadd.f32 %v207_v2, %v157_v4 }
  0xbc   :  { %3092 = vst [vmem:[#allocation57_spill] sm:$0xff] %v2421_v55 }
  0xbd   :  { %3093 = vst [vmem:[#allocation58_spill] sm:$0xff] %v2423_v56 }
  0xbf   :  { %v307_v63 = vpop.f32.mrf.mxu2  ;;  %v348_v0 = vpop.f32.mrf.mxu3 }
  0xc0   :  { %v2426_v62 = vadd.f32 %v307_v63, %v2371_v60  ;;  %v2429_v59 = vadd.f32 %v348_v0, %v2373_v3  ;;  %v228_v54 = vpop.f32.mrf.mxu0  ;;  %v269_v57 = vpop.f32.mrf.mxu1 }
  0xc1   :  { %v2431_v8 = vadd.f32 %v228_v54, %v157_v4  ;;  %v2433_v61 = vadd.f32 %v269_v57, %v158_v6  ;;  %v290_v54 = vadd.f32 %v2363_v1, %v2371_v60 }
  0xc2   :  { %3094 = vst [vmem:[#allocation59_spill] sm:$0xff] %v2426_v62 }
  0xc3   :  { %3095 = vst [vmem:[#allocation60_spill] sm:$0xff] %v2429_v59 }
  0xc4   :  { %3096 = vst [vmem:[#allocation61_spill] sm:$0xff] %v2431_v8 }
  0xc5   :  { %3097 = vst [vmem:[#allocation62_spill] sm:$0xff] %v2433_v61 }
  0xc7   :  { %v310_v47 = vpop.f32.mrf.mxu2  ;;  %v351_v55 = vpop.f32.mrf.mxu3 }
  0xc8   :  { %v2436_v5 = vadd.f32 %v310_v47, %v2371_v60  ;;  %v2439_v56 = vadd.f32 %v351_v55, %v2373_v3  ;;  %v409_v63 = vpop.f32.mrf.mxu0  ;;  %v429_v62 = vpop.f32.mrf.mxu1 }
  0xc9   :  { %v472_v0 = vadd.f32 %v409_v63, %v208_v34  ;;  %v473_v59 = vadd.f32 %v429_v62, %v249_v58  ;;  %v331_v58 = vadd.f32 %v2365_v7, %v2373_v3 }
  0xca   :  { %3098 = vst [vmem:[#allocation63_spill] sm:$0xff] %v2436_v5 }
  0xcb   :  { %3099 = vst [vmem:[#allocation64_spill] sm:$0xff] %v2439_v56  ;;  %v1654_v53 = vmul.f32 -1.442695, %v472_v0  ;;  %v1655_v52 = vmul.f32 -1.442695, %v473_v59 }
  0xcd   :  { %1683 = vpow2.f32 %v1654_v53 }
  0xce   :  { %1685 = vpow2.f32 %v1655_v52 }
  0xcf   :  { %v449_v2 = vpop.f32.mrf.mxu2  ;;  %v469_v56 = vpop.f32.mrf.mxu3 }
  0xd0   :  { %v474_v4 = vadd.f32 %v449_v2, %v290_v54  ;;  %v475_v59 = vadd.f32 %v469_v56, %v331_v58 }
  0xd2   :  { %v1656_v6 = vmul.f32 -1.442695, %v474_v4 }
  0xd3   :  { %v1684_v20 = vpop.eup %1683 }
  0xd4   :  { %v1686_v57 = vpop.eup %1685  ;;  %v485_v47 = vadd.f32 1.0, %v1684_v20  ;;  %1687 = vpow2.f32 %v1656_v6 }
  0xd5   :  { %v486_v55 = vadd.f32 1.0, %v1686_v57 }
  0xd6   :  { %1689 = vrcp.f32 %v485_v47  ;;  %v499_v54 = vand.u32 2147483648, %v485_v47  ;;  %v497_v6 = vand.u32 2147483647, %v485_v47  ;;  %vm493_vm3 = vweird.f32 %v485_v47 }
  0xd7   :  { %1691 = vrcp.f32 %v486_v55  ;;  %v514_v2 = vand.u32 2147483648, %v486_v55  ;;  %v512_v57 = vand.u32 2147483647, %v486_v55  ;;  %vm508_vm4 = vweird.f32 %v486_v55 }
  0xd8   :  { %v500_v56 = vor.u32 1.1754944e-38, %v499_v54  ;;  %vm498_vm6 = vcmp.eq.f32.partialorder %v497_v6, 8.507059e+37 }
  0xd9   :  { %v515_v58 = vor.u32 1.1754944e-38, %v514_v2  ;;  %vm513_vm8 = vcmp.eq.f32.partialorder %v512_v57, 8.507059e+37 }
  0xda   :  { %v1688_v34 = vpop.eup %1687 }
  0xdb   :  { %v487_v53 = vadd.f32 1.0, %v1688_v34 }
  0xdc   :  { %v1690_v62 = vpop.eup %1689 }
  0xdd   :  { %v1692_v1 = vpop.eup %1691  ;;  %v489_v52 = vmul.f32 %v1690_v62, %v485_v47  ;;  %1693 = vrcp.f32 %v487_v53  ;;  %vm494_vm1 = vweird.f32 %v1690_v62  ;;  %vm523_vm10 = vweird.f32 %v487_v53 }
  0xde   :  { %v504_v60 = vmul.f32 %v1692_v1, %v486_v55  ;;  %1695 = vtanh.f32 %v475_v59  ;;  %vm509_vm2 = vweird.f32 %v1692_v1  ;;  %vm495_vm5 = vmor %vm493_vm3, %vm494_vm1  ;;  %v529_v55 = vand.u32 2147483648, %v487_v53 }
  0xdf   :  { %v490_v63 = vsub.f32 1.0, %v489_v52  ;;  %vm510_vm7 = vmor %vm508_vm4, %vm509_vm2 }
  0xe0   :  { %v505_v0 = vsub.f32 1.0, %v504_v60  ;;  %v530_v2 = vor.u32 1.1754944e-38, %v529_v55 }
  0xe1   :  { %v491_v4 = vmul.f32 %v1690_v62, %v490_v63 }
  0xe2   :  { %v506_v20 = vmul.f32 %v1692_v1, %v505_v0 }
  0xe3   :  { %v1694_v5 = vpop.eup %1693  ;;  %v492_v3 = vadd.f32 %v1690_v62, %v491_v4 }
  0xe4   :  { %v519_v7 = vmul.f32 %v1694_v5, %v487_v53  ;;  %v507_v34 = vadd.f32 %v1692_v1, %v506_v20  ;;  %v1696_v59 = vpop.eup %1695  ;;  %vm524_vm9 = vweird.f32 %v1694_v5 }
  0xe5   :  { %v496_v52 = vsel %vm495_vm5, %v1690_v62, %v492_v3  ;;  %v527_v62 = vand.u32 2147483647, %v487_v53  ;;  %vm525_vm11 = vmor %vm523_vm10, %vm524_vm9 }
  0xe6   :  { %v520_v60 = vsub.f32 1.0, %v519_v7  ;;  %v501_v63 = vsel %vm498_vm6, %v500_v56, %v496_v52  ;;  %v511_v61 = vsel %vm510_vm7, %v1692_v1, %v507_v34  ;;  %v3129_v7 = vld [vmem:[#allocation40_spill] sm:$0xff] }
  0xe7   :  { %v516_v0 = vsel %vm513_vm8, %v515_v58, %v511_v61  ;;  %v535_v8 = vmul.f32 %v1696_v59, %v501_v63  ;;  %vm528_vm12 = vcmp.eq.f32.partialorder %v527_v62, 8.507059e+37 }
  0xe8   :  { %v534_v51 = vmul.f32 0.0, %v516_v0  ;;  %v521_v50 = vmul.f32 %v1694_v5, %v520_v60 }
  0xea   :  { %v2445_v4 = vadd.f32 %v535_v8, %v534_v51  ;;  %v522_v47 = vadd.f32 %v1694_v5, %v521_v50 }
  0xec   :  { %1697 = vtanh.f32 %v2445_v4  ;;  %v526_v54 = vsel %vm525_vm11, %v1694_v5, %v522_v47 }
  0xed   :  { %v531_v1 = vsel %vm528_vm12, %v530_v2, %v526_v54 }
  0xf2   :  { %v1698_v6 = vpop.eup %1697 }
  0xf3   :  { %v538_v20 = vmul.f32 %v1698_v6, %v531_v1 }
  0xf5   :  { %559 = vmatmul.f32.vlgmr.msra.gmra.mxu0 %v538_v20  ;;  %579 = vmatmul.f32.vlgmr.msra.gmra.mxu1 %v538_v20 }
  0xf6   :  { %599 = vmatmul.f32.vlgmr.msra.gmra.mxu2 %v538_v20  ;;  %619 = vmatmul.f32.vlgmr.msra.gmra.mxu3 %v538_v20 }
  0xf7   :  { %845 = vmatpush.msra.mxu0 %v1987_v9  ;;  %865 = vmatpush.msra.mxu1 %v1989_v10  ;;  %v3100_v9 = vld [vmem:[#allocation11_spill] sm:$0xff]  ;;  %v3101_v10 = vld [vmem:[#allocation12_spill] sm:$0xff] }
  0xf8   :  { %885 = vmatpush.msra.mxu2 %v1993_v11  ;;  %905 = vmatpush.msra.mxu3 %v2005_v15  ;;  %v3102_v11 = vld [vmem:[#allocation13_spill] sm:$0xff] }
  0xf9   :  { %846 = vmatpush.msra.mxu0 %v1997_v12  ;;  %866 = vmatpush.msra.mxu1 %v1999_v13  ;;  %v3103_v12 = vld [vmem:[#allocation14_spill] sm:$0xff]  ;;  %v3104_v13 = vld [vmem:[#allocation15_spill] sm:$0xff]  ;;  %v3106_v15 = vld [vmem:[#allocation17_spill] sm:$0xff] }
  0xfa   :  { %886 = vmatpush.msra.mxu2 %v2003_v14  ;;  %906 = vmatpush.msra.mxu3 %v2013_v18  ;;  %v3105_v14 = vld [vmem:[#allocation16_spill] sm:$0xff] }
  0xfb   :  { %847 = vmatpush.msra.mxu0 %v2008_v16  ;;  %867 = vmatpush.msra.mxu1 %v2010_v17  ;;  %v3107_v16 = vld [vmem:[#allocation18_spill] sm:$0xff]  ;;  %v3108_v17 = vld [vmem:[#allocation19_spill] sm:$0xff]  ;;  %v3109_v18 = vld [vmem:[#allocation20_spill] sm:$0xff] }
  0xfc   :  { %887 = vmatpush.msra.mxu2 %v2017_v19  ;;  %907 = vmatpush.msra.mxu3 %v2024_v21  ;;  %v3110_v19 = vld [vmem:[#allocation21_spill] sm:$0xff]  ;;  %v3111_v21 = vld [vmem:[#allocation22_spill] sm:$0xff] }
  0xfd   :  { %848 = vmatpush.msra.mxu0 %v2028_v22  ;;  %868 = vmatpush.msra.mxu1 %v2030_v23  ;;  %v3112_v22 = vld [vmem:[#allocation23_spill] sm:$0xff]  ;;  %v3113_v23 = vld [vmem:[#allocation24_spill] sm:$0xff] }
  0xfe   :  { %888 = vmatpush.msra.mxu2 %v2036_v24  ;;  %908 = vmatpush.msra.mxu3 %v2038_v25  ;;  %v3114_v24 = vld [vmem:[#allocation25_spill] sm:$0xff]  ;;  %v3115_v25 = vld [vmem:[#allocation26_spill] sm:$0xff] }
  0xff   :  { %849 = vmatpush.msra.mxu0 %v2042_v26  ;;  %869 = vmatpush.msra.mxu1 %v2044_v27  ;;  %v3116_v26 = vld [vmem:[#allocation27_spill] sm:$0xff]  ;;  %v3117_v27 = vld [vmem:[#allocation28_spill] sm:$0xff] }
 0x100   :  { %889 = vmatpush.msra.mxu2 %v2048_v28  ;;  %909 = vmatpush.msra.mxu3 %v2050_v29  ;;  %v3118_v28 = vld [vmem:[#allocation29_spill] sm:$0xff]  ;;  %v3119_v29 = vld [vmem:[#allocation30_spill] sm:$0xff] }
 0x101   :  { %850 = vmatpush.msra.mxu0 %v2053_v30  ;;  %870 = vmatpush.msra.mxu1 %v2055_v31  ;;  %v3120_v30 = vld [vmem:[#allocation31_spill] sm:$0xff]  ;;  %v3121_v31 = vld [vmem:[#allocation32_spill] sm:$0xff] }
 0x102   :  { %890 = vmatpush.msra.mxu2 %v2060_v32  ;;  %910 = vmatpush.msra.mxu3 %v2062_v33  ;;  %v3122_v32 = vld [vmem:[#allocation33_spill] sm:$0xff]  ;;  %v3123_v33 = vld [vmem:[#allocation34_spill] sm:$0xff] }
 0x103   :  { %851 = vmatpush.msra.mxu0 %v2071_v35  ;;  %871 = vmatpush.msra.mxu1 %v2073_v36  ;;  %v3124_v35 = vld [vmem:[#allocation35_spill] sm:$0xff]  ;;  %v3125_v36 = vld [vmem:[#allocation36_spill] sm:$0xff] }
 0x104   :  { %891 = vmatpush.msra.mxu2 %v2079_v37  ;;  %911 = vmatpush.msra.mxu3 %v2081_v38 }
 0x105   :  { %852 = vmatpush.msra.mxu0 %v2085_v39  ;;  %872 = vmatpush.msra.mxu1 %v2087_v40  ;;  %v3126_v39 = vld [vmem:[#allocation37_spill] sm:$0xff] }
 0x106   :  { %892 = vmatpush.msra.mxu2 %v2091_v41  ;;  %912 = vmatpush.msra.mxu3 %v2093_v42  ;;  %v3127_v41 = vld [vmem:[#allocation38_spill] sm:$0xff] }
 0x107   :  { %853 = vmatpush.msra.mxu0 %v2096_v43  ;;  %873 = vmatpush.msra.mxu1 %v2098_v44 }
 0x108   :  { %893 = vmatpush.msra.mxu2 %v2103_v45  ;;  %913 = vmatpush.msra.mxu3 %v2105_v46  ;;  %v3128_v46 = vld [vmem:[#allocation39_spill] sm:$0xff] }
 0x109   :  { %854 = vmatpush.msra.mxu0 %v2114_v48  ;;  %874 = vmatpush.msra.mxu1 %v2116_v49 }
 0x10a   :  { %894 = vmatpush.msra.mxu2 %v3100_v9  ;;  %914 = vmatpush.msra.mxu3 %v3101_v10 }
 0x10b   :  { %855 = vmatpush.msra.mxu0 %v3102_v11  ;;  %875 = vmatpush.msra.mxu1 %v3103_v12 }
 0x10c   :  { %895 = vmatpush.msra.mxu2 %v3104_v13  ;;  %915 = vmatpush.msra.mxu3 %v3105_v14 }
 0x10d   :  { %856 = vmatpush.msra.mxu0 %v3106_v15  ;;  %876 = vmatpush.msra.mxu1 %v3107_v16 }
 0x10e   :  { %896 = vmatpush.msra.mxu2 %v3108_v17  ;;  %916 = vmatpush.msra.mxu3 %v3109_v18 }
 0x10f   :  { %857 = vmatpush.msra.mxu0 %v3110_v19  ;;  %877 = vmatpush.msra.mxu1 %v3111_v21 }
 0x110   :  { %897 = vmatpush.msra.mxu2 %v3112_v22  ;;  %917 = vmatpush.msra.mxu3 %v3113_v23 }
 0x111   :  { %858 = vmatpush.msra.mxu0 %v3114_v24  ;;  %878 = vmatpush.msra.mxu1 %v3115_v25 }
 0x112   :  { %898 = vmatpush.msra.mxu2 %v3116_v26  ;;  %918 = vmatpush.msra.mxu3 %v3117_v27 }
 0x113   :  { %859 = vmatpush.msra.mxu0 %v3118_v28  ;;  %879 = vmatpush.msra.mxu1 %v3119_v29 }
 0x114   :  { %899 = vmatpush.msra.mxu2 %v3120_v30  ;;  %919 = vmatpush.msra.mxu3 %v3121_v31 }
 0x115   :  { %860 = vmatpush.msra.mxu0 %v3122_v32  ;;  %880 = vmatpush.msra.mxu1 %v3123_v33 }
 0x116   :  { %900 = vmatpush.msra.mxu2 %v3124_v35  ;;  %920 = vmatpush.msra.mxu3 %v3125_v36 }
 0x172   :  { %v560_v37 = vpop.f32.mrf.mxu0  ;;  %v580_v38 = vpop.f32.mrf.mxu1 }
 0x173   :  { %v623_v40 = vadd.f32 %v560_v37, %v3126_v39  ;;  %v624_v42 = vadd.f32 %v580_v38, %v3127_v41  ;;  %v2523_v37 = vld [vmem:[#allocation5 + $0x1e8] sm:$0xff]  ;;  %v2526_v38 = vld [vmem:[#allocation5 + $0x1f0] sm:$0xff]  ;;  %v2529_v39 = vld [vmem:[#allocation5 + $0x1f8] sm:$0xff] }
 0x174   :  { %v2535_v41 = vld [vmem:[#allocation5 + $0x1c8] sm:$0xff] }
 0x175   :  { %v1657_v43 = vmul.f32 -1.442695, %v623_v40  ;;  %v1658_v44 = vmul.f32 -1.442695, %v624_v42  ;;  %v2532_v40 = vld [vmem:[#allocation5 + $0x1c0] sm:$0xff]  ;;  %v2538_v42 = vld [vmem:[#allocation5 + $0x1d0] sm:$0xff] }
 0x177   :  { %1699 = vpow2.f32 %v1657_v43  ;;  %v2541_v43 = vld [vmem:[#allocation5 + $0x1d8] sm:$0xff] }
 0x178   :  { %1701 = vpow2.f32 %v1658_v44  ;;  %v2544_v44 = vld [vmem:[#allocation5 + $0x1a0] sm:$0xff] }
 0x179   :  { %v600_v45 = vpop.f32.mrf.mxu2  ;;  %v620_v5 = vpop.f32.mrf.mxu3 }
 0x17a   :  { %v625_v48 = vadd.f32 %v600_v45, %v3128_v46  ;;  %v626_v56 = vadd.f32 %v620_v5, %v3129_v7  ;;  %v2547_v45 = vld [vmem:[#allocation5 + $0x1a8] sm:$0xff]  ;;  %v2550_v46 = vld [vmem:[#allocation5 + $0x1b0] sm:$0xff] }
 0x17b   :  { %v2571_v5 = vld [vmem:[#allocation5 + $0x168] sm:$0xff] }
 0x17c   :  { %v1659_v49 = vmul.f32 -1.442695, %v625_v48  ;;  %v2553_v48 = vld [vmem:[#allocation5 + $0x1b8] sm:$0xff]  ;;  %v2583_v7 = vld [vmem:[#allocation5 + $0x148] sm:$0xff] }
 0x17d   :  { %v1700_v50 = vpop.eup %1699 }
 0x17e   :  { %v1702_v51 = vpop.eup %1701  ;;  %v636_v8 = vadd.f32 1.0, %v1700_v50  ;;  %1703 = vpow2.f32 %v1659_v49  ;;  %v2556_v49 = vld [vmem:[#allocation5 + $0x180] sm:$0xff]  ;;  %v2559_v50 = vld [vmem:[#allocation5 + $0x188] sm:$0xff] }
 0x17f   :  { %v637_v61 = vadd.f32 1.0, %v1702_v51  ;;  %v2562_v51 = vld [vmem:[#allocation5 + $0x190] sm:$0xff] }
 0x180   :  { %1705 = vrcp.f32 %v636_v8  ;;  %v650_v63 = vand.u32 2147483648, %v636_v8  ;;  %v648_v55 = vand.u32 2147483647, %v636_v8  ;;  %vm644_vm15 = vweird.f32 %v636_v8 }
 0x181   :  { %1707 = vrcp.f32 %v637_v61  ;;  %v665_v0 = vand.u32 2147483648, %v637_v61  ;;  %v663_v54 = vand.u32 2147483647, %v637_v61  ;;  %vm659_vm0 = vweird.f32 %v637_v61 }
 0x182   :  { %v651_v20 = vor.u32 1.1754944e-38, %v650_v63  ;;  %vm649_vm3 = vcmp.eq.f32.partialorder %v648_v55, 8.507059e+37  ;;  %v2604_v63 = vld [vmem:[#allocation5 + $0x100] sm:$0xff]  ;;  %v2613_v55 = vld [vmem:[#allocation5 + $0x118] sm:$0xff] }
 0x183   :  { %v666_v10 = vor.u32 1.1754944e-38, %v665_v0  ;;  %vm664_vm4 = vcmp.eq.f32.partialorder %v663_v54, 8.507059e+37  ;;  %v2607_v0 = vld [vmem:[#allocation5 + $0x108] sm:$0xff] }
 0x184   :  { %v1704_v53 = vpop.eup %1703  ;;  %v2619_v54 = vld [vmem:[#allocation5 + $0xe8] sm:$0xff] }
 0x185   :  { %v638_v57 = vadd.f32 1.0, %v1704_v53  ;;  %v2574_v53 = vld [vmem:[#allocation5 + $0x170] sm:$0xff] }
 0x186   :  { %v1706_v3 = vpop.eup %1705 }
 0x187   :  { %v1708_v34 = vpop.eup %1707  ;;  %v640_v58 = vmul.f32 %v1706_v3, %v636_v8  ;;  %1709 = vrcp.f32 %v638_v57  ;;  %vm645_vm13 = vweird.f32 %v1706_v3  ;;  %v680_v23 = vand.u32 2147483648, %v638_v57  ;;  %v2565_v8 = vld [vmem:[#allocation5 + $0x198] sm:$0xff] }
 0x188   :  { %v655_v52 = vmul.f32 %v1708_v34, %v637_v61  ;;  %1711 = vtanh.f32 %v626_v56  ;;  %vm660_vm14 = vweird.f32 %v1708_v34  ;;  %vm646_vm1 = vmor %vm644_vm15, %vm645_vm13  ;;  %vm674_vm6 = vweird.f32 %v638_v57  ;;  %v2568_v61 = vld [vmem:[#allocation5 + $0x160] sm:$0xff]  ;;  %v2586_v56 = vld [vmem:[#allocation5 + $0x150] sm:$0xff] }
 0x189   :  { %v641_v59 = vsub.f32 1.0, %v640_v58  ;;  %vm661_vm2 = vmor %vm659_vm0, %vm660_vm14  ;;  %v678_v24 = vand.u32 2147483647, %v638_v57  ;;  %v681_v26 = vor.u32 1.1754944e-38, %v680_v23  ;;  %v2592_v58 = vld [vmem:[#allocation5 + $0x120] sm:$0xff]  ;;  %v2670_v23 = vld [vmem:[#allocation5 + $0x70] sm:$0xff] }
 0x18a   :  { %v656_v60 = vsub.f32 1.0, %v655_v52  ;;  %v2595_v52 = vld [vmem:[#allocation5 + $0x128] sm:$0xff]  ;;  %3142 = vst [vmem:[#allocation23_spill] sm:$0xff] %v2670_v23 }
 0x18b   :  { %v642_v47 = vmul.f32 %v1706_v3, %v641_v59  ;;  %vm679_vm8 = vcmp.eq.f32.partialorder %v678_v24, 8.507059e+37  ;;  %v2598_v59 = vld [vmem:[#allocation5 + $0x130] sm:$0xff]  ;;  %v2673_v24 = vld [vmem:[#allocation5 + $0x78] sm:$0xff] }
 0x18c   :  { %v657_v62 = vmul.f32 %v1708_v34, %v656_v60  ;;  %v2601_v60 = vld [vmem:[#allocation5 + $0x138] sm:$0xff]  ;;  %3143 = vst [vmem:[#allocation24_spill] sm:$0xff] %v2673_v24 }
 0x18d   :  { %v1710_v2 = vpop.eup %1709  ;;  %v643_v6 = vadd.f32 %v1706_v3, %v642_v47  ;;  %v2610_v47 = vld [vmem:[#allocation5 + $0x110] sm:$0xff] }
 0x18e   :  { %v670_v1 = vmul.f32 %v1710_v2, %v638_v57  ;;  %v658_v9 = vadd.f32 %v1708_v34, %v657_v62  ;;  %v1712_v12 = vpop.eup %1711  ;;  %vm675_vm5 = vweird.f32 %v1710_v2  ;;  %v2577_v57 = vld [vmem:[#allocation5 + $0x178] sm:$0xff]  ;;  %v2616_v62 = vld [vmem:[#allocation5 + $0xe0] sm:$0xff] }
 0x18f   :  { %v647_v11 = vsel %vm646_vm1, %v1706_v3, %v643_v6  ;;  %vm676_vm7 = vmor %vm674_vm6, %vm675_vm5  ;;  %v2580_v3 = vld [vmem:[#allocation5 + $0x140] sm:$0xff]  ;;  %v2625_v6 = vld [vmem:[#allocation5 + $0xf8] sm:$0xff] }
 0x190   :  { %v671_v13 = vsub.f32 1.0, %v670_v1  ;;  %v652_v14 = vsel %vm649_vm3, %v651_v20, %v647_v11  ;;  %v662_v15 = vsel %vm661_vm2, %v1708_v34, %v658_v9  ;;  %v2589_v34 = vld [vmem:[#allocation5 + $0x158] sm:$0xff]  ;;  %v2628_v1 = vld [vmem:[#allocation5 + $0xc0] sm:$0xff]  ;;  %v2631_v20 = vld [vmem:[#allocation5 + $0xc8] sm:$0xff] }
 0x191   :  { %v667_v16 = vsel %vm664_vm4, %v666_v10, %v662_v15  ;;  %v686_v17 = vmul.f32 %v1712_v12, %v652_v14  ;;  %v2634_v9 = vld [vmem:[#allocation5 + $0xd0] sm:$0xff]  ;;  %v2637_v10 = vld [vmem:[#allocation5 + $0xd8] sm:$0xff]  ;;  %v2640_v11 = vld [vmem:[#allocation5 + $0xa0] sm:$0xff] }
 0x192   :  { %v685_v18 = vmul.f32 %v667_v16, %v2445_v4  ;;  %v672_v19 = vmul.f32 %v1710_v2, %v671_v13  ;;  %v2520_v4 = vld [vmem:[#allocation5 + $0x1e0] sm:$0xff]  ;;  %3130 = vst [vmem:[#allocation11_spill] sm:$0xff] %v2634_v9  ;;  %v2643_v12 = vld [vmem:[#allocation5 + $0xa8] sm:$0xff]  ;;  %v2646_v13 = vld [vmem:[#allocation5 + $0xb0] sm:$0xff] }
 0x193   :  { %3131 = vst [vmem:[#allocation12_spill] sm:$0xff] %v2637_v10  ;;  %v2649_v14 = vld [vmem:[#allocation5 + $0xb8] sm:$0xff]  ;;  %v2652_v15 = vld [vmem:[#allocation5 + $0x80] sm:$0xff]  ;;  %v2655_v16 = vld [vmem:[#allocation5 + $0x88] sm:$0xff] }
 0x194   :  { %v2517_v21 = vadd.f32 %v686_v17, %v685_v18  ;;  %v673_v22 = vadd.f32 %v1710_v2, %v672_v19  ;;  %3132 = vst [vmem:[#allocation13_spill] sm:$0xff] %v2640_v11  ;;  %v2658_v17 = vld [vmem:[#allocation5 + $0x90] sm:$0xff]  ;;  %v2661_v18 = vld [vmem:[#allocation5 + $0x98] sm:$0xff]  ;;  %v2664_v19 = vld [vmem:[#allocation5 + $0x60] sm:$0xff] }
 0x195   :  { %3133 = vst [vmem:[#allocation14_spill] sm:$0xff] %v2643_v12 }
 0x196   :  { %1713 = vtanh.f32 %v2517_v21  ;;  %v677_v25 = vsel %vm676_vm7, %v1710_v2, %v673_v22  ;;  %v2622_v2 = vld [vmem:[#allocation5 + $0xf0] sm:$0xff]  ;;  %3134 = vst [vmem:[#allocation15_spill] sm:$0xff] %v2646_v13  ;;  %v2667_v22 = vld [vmem:[#allocation5 + $0x68] sm:$0xff] }
 0x197   :  { %v682_v28 = vsel %vm679_vm8, %v681_v26, %v677_v25  ;;  %3135 = vst [vmem:[#allocation16_spill] sm:$0xff] %v2649_v14  ;;  %v2676_v25 = vld [vmem:[#allocation5 + $0x40] sm:$0xff]  ;;  %v2679_v26 = vld [vmem:[#allocation5 + $0x48] sm:$0xff] }
 0x198   :  { %3136 = vst [vmem:[#allocation17_spill] sm:$0xff] %v2652_v15 }
 0x199   :  { %3137 = vst [vmem:[#allocation18_spill] sm:$0xff] %v2655_v16 }
 0x19a   :  { %3138 = vst [vmem:[#allocation19_spill] sm:$0xff] %v2658_v17 }
 0x19b   :  { %3139 = vst [vmem:[#allocation20_spill] sm:$0xff] %v2661_v18 }
 0x19c   :  { %v1714_v27 = vpop.eup %1713  ;;  %3140 = vst [vmem:[#allocation21_spill] sm:$0xff] %v2664_v19 }
 0x19d   :  { %v689_v29 = vmul.f32 %v1714_v27, %v682_v28  ;;  %3141 = vst [vmem:[#allocation22_spill] sm:$0xff] %v2667_v22  ;;  %v2682_v27 = vld [vmem:[#allocation5 + $0x50] sm:$0xff]  ;;  %v2685_v28 = vld [vmem:[#allocation5 + $0x58] sm:$0xff] }
 0x19e   :  { %3144 = vst [vmem:[#allocation25_spill] sm:$0xff] %v2676_v25 }
 0x19f   :  { %710 = vmatmul.f32.vlgmr.msrb.gmra.mxu0 %v689_v29  ;;  %730 = vmatmul.f32.vlgmr.msrb.gmra.mxu1 %v689_v29  ;;  %3145 = vst [vmem:[#allocation26_spill] sm:$0xff] %v2679_v26 }
 0x1a0   :  { %750 = vmatmul.f32.vlgmr.msrb.gmra.mxu2 %v689_v29  ;;  %770 = vmatmul.f32.vlgmr.msrb.gmra.mxu3 %v689_v29  ;;  %3146 = vst [vmem:[#allocation27_spill] sm:$0xff] %v2682_v27  ;;  %v2688_v29 = vld [vmem:[#allocation5 + $0x20] sm:$0xff] }
 0x1a1   :  { %996 = vmatpush.msrb.mxu0 %v2520_v4  ;;  %1016 = vmatpush.msrb.mxu1 %v2523_v37  ;;  %3147 = vst [vmem:[#allocation28_spill] sm:$0xff] %v2685_v28 }
 0x1a2   :  { %1036 = vmatpush.msrb.mxu2 %v2526_v38  ;;  %1056 = vmatpush.msrb.mxu3 %v2529_v39  ;;  %3148 = vst [vmem:[#allocation29_spill] sm:$0xff] %v2688_v29 }
 0x1a3   :  { %997 = vmatpush.msrb.mxu0 %v2532_v40  ;;  %1017 = vmatpush.msrb.mxu1 %v2535_v41 }
 0x1a4   :  { %1037 = vmatpush.msrb.mxu2 %v2538_v42  ;;  %1057 = vmatpush.msrb.mxu3 %v2541_v43 }
 0x1a5   :  { %998 = vmatpush.msrb.mxu0 %v2544_v44  ;;  %1018 = vmatpush.msrb.mxu1 %v2547_v45 }
 0x1a6   :  { %1038 = vmatpush.msrb.mxu2 %v2550_v46  ;;  %1058 = vmatpush.msrb.mxu3 %v2553_v48 }
 0x1a7   :  { %999 = vmatpush.msrb.mxu0 %v2556_v49  ;;  %1019 = vmatpush.msrb.mxu1 %v2559_v50 }
 0x1a8   :  { %1039 = vmatpush.msrb.mxu2 %v2562_v51  ;;  %1059 = vmatpush.msrb.mxu3 %v2565_v8 }
 0x1a9   :  { %1000 = vmatpush.msrb.mxu0 %v2568_v61  ;;  %1020 = vmatpush.msrb.mxu1 %v2571_v5 }
 0x1aa   :  { %1040 = vmatpush.msrb.mxu2 %v2574_v53  ;;  %1060 = vmatpush.msrb.mxu3 %v2577_v57 }
 0x1ab   :  { %1001 = vmatpush.msrb.mxu0 %v2580_v3  ;;  %1021 = vmatpush.msrb.mxu1 %v2583_v7 }
 0x1ac   :  { %1041 = vmatpush.msrb.mxu2 %v2586_v56  ;;  %1061 = vmatpush.msrb.mxu3 %v2589_v34 }
 0x1ad   :  { %1002 = vmatpush.msrb.mxu0 %v2592_v58  ;;  %1022 = vmatpush.msrb.mxu1 %v2595_v52 }
 0x1ae   :  { %1042 = vmatpush.msrb.mxu2 %v2598_v59  ;;  %1062 = vmatpush.msrb.mxu3 %v2601_v60 }
 0x1af   :  { %1003 = vmatpush.msrb.mxu0 %v2604_v63  ;;  %1023 = vmatpush.msrb.mxu1 %v2607_v0 }
 0x1b0   :  { %1043 = vmatpush.msrb.mxu2 %v2610_v47  ;;  %1063 = vmatpush.msrb.mxu3 %v2613_v55 }
 0x1b1   :  { %1004 = vmatpush.msrb.mxu0 %v2616_v62  ;;  %1024 = vmatpush.msrb.mxu1 %v2619_v54 }
 0x1b2   :  { %1044 = vmatpush.msrb.mxu2 %v2622_v2  ;;  %1064 = vmatpush.msrb.mxu3 %v2625_v6 }
 0x1b3   :  { %1005 = vmatpush.msrb.mxu0 %v2628_v1  ;;  %1025 = vmatpush.msrb.mxu1 %v2631_v20 }
 0x1b4   :  { %1045 = vmatpush.msrb.mxu2 %v2634_v9  ;;  %1065 = vmatpush.msrb.mxu3 %v2637_v10 }
 0x1b5   :  { %1006 = vmatpush.msrb.mxu0 %v2640_v11  ;;  %1026 = vmatpush.msrb.mxu1 %v2643_v12 }
 0x1b6   :  { %1046 = vmatpush.msrb.mxu2 %v2646_v13  ;;  %1066 = vmatpush.msrb.mxu3 %v2649_v14 }
 0x1b7   :  { %1007 = vmatpush.msrb.mxu0 %v2652_v15  ;;  %1027 = vmatpush.msrb.mxu1 %v2655_v16 }
 0x1b8   :  { %1047 = vmatpush.msrb.mxu2 %v2658_v17  ;;  %1067 = vmatpush.msrb.mxu3 %v2661_v18 }
 0x1b9   :  { %1008 = vmatpush.msrb.mxu0 %v2664_v19  ;;  %1028 = vmatpush.msrb.mxu1 %v2667_v22 }
 0x1ba   :  { %1048 = vmatpush.msrb.mxu2 %v2670_v23  ;;  %1068 = vmatpush.msrb.mxu3 %v2673_v24  ;;  %v2691_v24 = vld [vmem:[#allocation5 + $0x28] sm:$0xff] }
 0x1bb   :  { %1009 = vmatpush.msrb.mxu0 %v2676_v25  ;;  %1029 = vmatpush.msrb.mxu1 %v2679_v26  ;;  %3149 = vst [vmem:[#allocation30_spill] sm:$0xff] %v2691_v24  ;;  %v3150_v26 = vld [vmem:[#allocation41_spill] sm:$0xff]  ;;  %v3151_v25 = vld [vmem:[#allocation42_spill] sm:$0xff] }
 0x1bc   :  { %1049 = vmatpush.msrb.mxu2 %v2682_v27  ;;  %1069 = vmatpush.msrb.mxu3 %v2685_v28 }
 0x1bd   :  { %1010 = vmatpush.msrb.mxu0 %v2688_v29  ;;  %1030 = vmatpush.msrb.mxu1 %v2691_v24 }
 0x1be   :  { %1050 = vmatpush.msrb.mxu2 %v3120_v30  ;;  %1070 = vmatpush.msrb.mxu3 %v3121_v31  ;;  %v3152_v31 = vld [vmem:[#allocation43_spill] sm:$0xff] }
 0x1bf   :  { %1011 = vmatpush.msrb.mxu0 %v3122_v32  ;;  %1031 = vmatpush.msrb.mxu1 %v3123_v33 }
 0x1c0   :  { %1051 = vmatpush.msrb.mxu2 %v3124_v35  ;;  %1071 = vmatpush.msrb.mxu3 %v3125_v36 }
 0x21c   :  { %v711_v28 = vpop.f32.mrf.mxu0  ;;  %v731_v27 = vpop.f32.mrf.mxu1 }
 0x21d   :  { %v774_v29 = vadd.f32 %v711_v28, %v3150_v26  ;;  %v775_v23 = vadd.f32 %v731_v27, %v3151_v25  ;;  %v3153_v25 = vld [vmem:[#allocation44_spill] sm:$0xff] }
 0x21f   :  { %v1660_v22 = vmul.f32 -1.442695, %v774_v29  ;;  %v1661_v24 = vmul.f32 -1.442695, %v775_v23 }
 0x221   :  { %1715 = vpow2.f32 %v1660_v22 }
 0x222   :  { %1717 = vpow2.f32 %v1661_v24 }
 0x223   :  { %v751_v30 = vpop.f32.mrf.mxu2  ;;  %v771_v36 = vpop.f32.mrf.mxu3 }
 0x224   :  { %v776_v19 = vadd.f32 %v751_v30, %v3152_v31  ;;  %v777_v27 = vadd.f32 %v771_v36, %v3153_v25 }
 0x226   :  { %v1662_v32 = vmul.f32 -1.442695, %v776_v19 }
 0x227   :  { %v1716_v18 = vpop.eup %1715 }
 0x228   :  { %v1718_v33 = vpop.eup %1717  ;;  %v787_v17 = vadd.f32 1.0, %v1716_v18  ;;  %1719 = vpow2.f32 %v1662_v32 }
 0x229   :  { %v788_v35 = vadd.f32 1.0, %v1718_v33 }
 0x22a   :  { %1721 = vrcp.f32 %v787_v17  ;;  %v801_v19 = vand.u32 2147483648, %v787_v17  ;;  %v799_v32 = vand.u32 2147483647, %v787_v17  ;;  %vm795_vm11 = vweird.f32 %v787_v17 }
 0x22b   :  { %1723 = vrcp.f32 %v788_v35  ;;  %v816_v31 = vand.u32 2147483648, %v788_v35  ;;  %v814_v15 = vand.u32 2147483647, %v788_v35  ;;  %vm810_vm12 = vweird.f32 %v788_v35 }
 0x22c   :  { %v802_v25 = vor.u32 1.1754944e-38, %v801_v19  ;;  %vm800_vm15 = vcmp.eq.f32.partialorder %v799_v32, 8.507059e+37 }
 0x22d   :  { %vm815_vm0 = vcmp.eq.f32.partialorder %v814_v15, 8.507059e+37 }
 0x22e   :  { %v1720_v16 = vpop.eup %1719 }
 0x22f   :  { %v789_v26 = vadd.f32 1.0, %v1720_v16 }
 0x230   :  { %v1722_v28 = vpop.eup %1721 }
 0x231   :  { %v1724_v23 = vpop.eup %1723  ;;  %v791_v22 = vmul.f32 %v1722_v28, %v787_v17  ;;  %1725 = vrcp.f32 %v789_v26  ;;  %vm796_vm9 = vweird.f32 %v1722_v28  ;;  %v831_v19 = vand.u32 2147483648, %v789_v26 }
 0x232   :  { %v806_v24 = vmul.f32 %v1724_v23, %v788_v35  ;;  %1727 = vtanh.f32 %v777_v27  ;;  %vm811_vm10 = vweird.f32 %v1724_v23  ;;  %vm797_vm13 = vmor %vm795_vm11, %vm796_vm9  ;;  %vm825_vm2 = vweird.f32 %v789_v26 }
 0x233   :  { %v792_v29 = vsub.f32 1.0, %v791_v22  ;;  %vm812_vm14 = vmor %vm810_vm12, %vm811_vm10  ;;  %v817_v22 = vor.u32 1.1754944e-38, %v816_v31  ;;  %v832_v32 = vor.u32 1.1754944e-38, %v831_v19  ;;  %v3172_v19 = vld [vmem:[#allocation29_spill] sm:$0xff] }
 0x234   :  { %v807_v30 = vsub.f32 1.0, %v806_v24 }
 0x235   :  { %v793_v18 = vmul.f32 %v1722_v28, %v792_v29 }
 0x236   :  { %v808_v33 = vmul.f32 %v1724_v23, %v807_v30 }
 0x237   :  { %v1726_v14 = vpop.eup %1725  ;;  %v794_v16 = vadd.f32 %v1722_v28, %v793_v18 }
 0x238   :  { %v821_v36 = vmul.f32 %v1726_v14, %v789_v26  ;;  %v809_v13 = vadd.f32 %v1724_v23, %v808_v33  ;;  %v1728_v27 = vpop.eup %1727  ;;  %vm826_vm1 = vweird.f32 %v1726_v14  ;;  %v3161_v33 = vld [vmem:[#allocation18_spill] sm:$0xff] }
 0x239   :  { %v798_v24 = vsel %vm797_vm13, %v1722_v28, %v794_v16  ;;  %v829_v28 = vand.u32 2147483647, %v789_v26  ;;  %vm827_vm3 = vmor %vm825_vm2, %vm826_vm1  ;;  %v3159_v26 = vld [vmem:[#allocation16_spill] sm:$0xff]  ;;  %v3162_v16 = vld [vmem:[#allocation19_spill] sm:$0xff] }
 0x23a   :  { %v822_v12 = vsub.f32 1.0, %v821_v36  ;;  %v803_v29 = vsel %vm800_vm15, %v802_v25, %v798_v24  ;;  %v813_v11 = vsel %vm812_vm14, %v1724_v23, %v809_v13  ;;  %v3160_v23 = vld [vmem:[#allocation17_spill] sm:$0xff]  ;;  %v3163_v36 = vld [vmem:[#allocation20_spill] sm:$0xff]  ;;  %v3166_v24 = vld [vmem:[#allocation23_spill] sm:$0xff] }
 0x23b   :  { %v818_v30 = vsel %vm815_vm0, %v817_v22, %v813_v11  ;;  %v837_v10 = vmul.f32 %v1728_v27, %v803_v29  ;;  %vm830_vm4 = vcmp.eq.f32.partialorder %v829_v28, 8.507059e+37  ;;  %v3164_v25 = vld [vmem:[#allocation21_spill] sm:$0xff]  ;;  %v3165_v22 = vld [vmem:[#allocation22_spill] sm:$0xff]  ;;  %v3167_v27 = vld [vmem:[#allocation24_spill] sm:$0xff] }
 0x23c   :  { %v836_v9 = vmul.f32 %v818_v30, %v2517_v21  ;;  %v823_v18 = vmul.f32 %v1726_v14, %v822_v12  ;;  %v3154_v21 = vld [vmem:[#allocation11_spill] sm:$0xff]  ;;  %v3157_v12 = vld [vmem:[#allocation14_spill] sm:$0xff]  ;;  %v3168_v29 = vld [vmem:[#allocation25_spill] sm:$0xff] }
 0x23d   :  { %v3169_v30 = vld [vmem:[#allocation26_spill] sm:$0xff] }
 0x23e   :  { %v2705_v17 = vadd.f32 %v837_v10, %v836_v9  ;;  %v824_v35 = vadd.f32 %v1726_v14, %v823_v18  ;;  %v3155_v9 = vld [vmem:[#allocation12_spill] sm:$0xff]  ;;  %v3156_v10 = vld [vmem:[#allocation13_spill] sm:$0xff]  ;;  %v3170_v18 = vld [vmem:[#allocation27_spill] sm:$0xff] }
 0x23f   :  { %v3173_v28 = vld [vmem:[#allocation30_spill] sm:$0xff] }
 0x240   :  { %1729 = vtanh.f32 %v2705_v17  ;;  %v828_v31 = vsel %vm827_vm3, %v1726_v14, %v824_v35  ;;  %v3158_v14 = vld [vmem:[#allocation15_spill] sm:$0xff]  ;;  %v3171_v35 = vld [vmem:[#allocation28_spill] sm:$0xff] }
 0x241   :  { %v833_v15 = vsel %vm830_vm4, %v832_v32, %v828_v31  ;;  %v2766_v31 = vld [vmem:[#allocation5 + $0x30] sm:$0xff]  ;;  %v2769_v32 = vld [vmem:[#allocation5 + $0x38] sm:$0xff] }
 0x242   :  { %3174 = vst [vmem:[#allocation31_spill] sm:$0xff] %v2766_v31 }
 0x243   :  { %3175 = vst [vmem:[#allocation32_spill] sm:$0xff] %v2769_v32 }
 0x246   :  { %v1730_v13 = vpop.eup %1729 }
 0x247   :  { %v840_v11 = vmul.f32 %v1730_v13, %v833_v15  ;;  %v2772_v13 = vld [vmem:[#allocation5] sm:$0xff]  ;;  %v2775_v15 = vld [vmem:[#allocation5 + $0x8] sm:$0xff] }
 0x248   :  { %3176 = vst [vmem:[#allocation33_spill] sm:$0xff] %v2772_v13 }
 0x249   :  { %861 = vmatmul.f32.vlgmr.msra.gmra.mxu0 %v840_v11  ;;  %881 = vmatmul.f32.vlgmr.msra.gmra.mxu1 %v840_v11  ;;  %3177 = vst [vmem:[#allocation34_spill] sm:$0xff] %v2775_v15 }
 0x24a   :  { %901 = vmatmul.f32.vlgmr.msra.gmra.mxu2 %v840_v11  ;;  %921 = vmatmul.f32.vlgmr.msra.gmra.mxu3 %v840_v11  ;;  %v2778_v11 = vld [vmem:[#allocation5 + $0x10] sm:$0xff] }
 0x24b   :  { %1147 = vmatpush.msra.mxu0 %v2520_v4  ;;  %1167 = vmatpush.msra.mxu1 %v2523_v37  ;;  %3178 = vst [vmem:[#allocation35_spill] sm:$0xff] %v2778_v11 }
 0x24c   :  { %1187 = vmatpush.msra.mxu2 %v2526_v38  ;;  %1207 = vmatpush.msra.mxu3 %v2529_v39 }
 0x24d   :  { %1148 = vmatpush.msra.mxu0 %v2532_v40  ;;  %1168 = vmatpush.msra.mxu1 %v2535_v41 }
 0x24e   :  { %1188 = vmatpush.msra.mxu2 %v2538_v42  ;;  %1208 = vmatpush.msra.mxu3 %v2541_v43 }
 0x24f   :  { %1149 = vmatpush.msra.mxu0 %v2544_v44  ;;  %1169 = vmatpush.msra.mxu1 %v2547_v45 }
 0x250   :  { %1189 = vmatpush.msra.mxu2 %v2550_v46  ;;  %1209 = vmatpush.msra.mxu3 %v2553_v48 }
 0x251   :  { %1150 = vmatpush.msra.mxu0 %v2556_v49  ;;  %1170 = vmatpush.msra.mxu1 %v2559_v50 }
 0x252   :  { %1190 = vmatpush.msra.mxu2 %v2562_v51  ;;  %1210 = vmatpush.msra.mxu3 %v2565_v8 }
 0x253   :  { %1151 = vmatpush.msra.mxu0 %v2568_v61  ;;  %1171 = vmatpush.msra.mxu1 %v2571_v5 }
 0x254   :  { %1191 = vmatpush.msra.mxu2 %v2574_v53  ;;  %1211 = vmatpush.msra.mxu3 %v2577_v57 }
 0x255   :  { %1152 = vmatpush.msra.mxu0 %v2580_v3  ;;  %1172 = vmatpush.msra.mxu1 %v2583_v7 }
 0x256   :  { %1192 = vmatpush.msra.mxu2 %v2586_v56  ;;  %1212 = vmatpush.msra.mxu3 %v2589_v34 }
 0x257   :  { %1153 = vmatpush.msra.mxu0 %v2592_v58  ;;  %1173 = vmatpush.msra.mxu1 %v2595_v52 }
 0x258   :  { %1193 = vmatpush.msra.mxu2 %v2598_v59  ;;  %1213 = vmatpush.msra.mxu3 %v2601_v60 }
 0x259   :  { %1154 = vmatpush.msra.mxu0 %v2604_v63  ;;  %1174 = vmatpush.msra.mxu1 %v2607_v0 }
 0x25a   :  { %1194 = vmatpush.msra.mxu2 %v2610_v47  ;;  %1214 = vmatpush.msra.mxu3 %v2613_v55 }
 0x25b   :  { %1155 = vmatpush.msra.mxu0 %v2616_v62  ;;  %1175 = vmatpush.msra.mxu1 %v2619_v54 }
 0x25c   :  { %1195 = vmatpush.msra.mxu2 %v2622_v2  ;;  %1215 = vmatpush.msra.mxu3 %v2625_v6 }
 0x25d   :  { %1156 = vmatpush.msra.mxu0 %v2628_v1  ;;  %1176 = vmatpush.msra.mxu1 %v2631_v20 }
 0x25e   :  { %1196 = vmatpush.msra.mxu2 %v3154_v21  ;;  %1216 = vmatpush.msra.mxu3 %v3155_v9 }
 0x25f   :  { %1157 = vmatpush.msra.mxu0 %v3156_v10  ;;  %1177 = vmatpush.msra.mxu1 %v3157_v12 }
 0x260   :  { %1197 = vmatpush.msra.mxu2 %v3158_v14  ;;  %1217 = vmatpush.msra.mxu3 %v3159_v26 }
 0x261   :  { %1158 = vmatpush.msra.mxu0 %v3160_v23  ;;  %1178 = vmatpush.msra.mxu1 %v3161_v33 }
 0x262   :  { %1198 = vmatpush.msra.mxu2 %v3162_v16  ;;  %1218 = vmatpush.msra.mxu3 %v3163_v36 }
 0x263   :  { %1159 = vmatpush.msra.mxu0 %v3164_v25  ;;  %1179 = vmatpush.msra.mxu1 %v3165_v22 }
 0x264   :  { %1199 = vmatpush.msra.mxu2 %v3166_v24  ;;  %1219 = vmatpush.msra.mxu3 %v3167_v27 }
 0x265   :  { %1160 = vmatpush.msra.mxu0 %v3168_v29  ;;  %1180 = vmatpush.msra.mxu1 %v3169_v30 }
 0x266   :  { %1200 = vmatpush.msra.mxu2 %v3170_v18  ;;  %1220 = vmatpush.msra.mxu3 %v3171_v35  ;;  %v3180_v35 = vld [vmem:[#allocation45_spill] sm:$0xff]  ;;  %v3181_v18 = vld [vmem:[#allocation46_spill] sm:$0xff] }
 0x267   :  { %1161 = vmatpush.msra.mxu0 %v3172_v19  ;;  %1181 = vmatpush.msra.mxu1 %v3173_v28  ;;  %v2781_v28 = vld [vmem:[#allocation5 + $0x18] sm:$0xff] }
 0x268   :  { %1201 = vmatpush.msra.mxu2 %v2766_v31  ;;  %1221 = vmatpush.msra.mxu3 %v2769_v32  ;;  %3179 = vst [vmem:[#allocation36_spill] sm:$0xff] %v2781_v28 }
 0x269   :  { %1162 = vmatpush.msra.mxu0 %v2772_v13  ;;  %1182 = vmatpush.msra.mxu1 %v2775_v15  ;;  %v3182_v15 = vld [vmem:[#allocation47_spill] sm:$0xff] }
 0x26a   :  { %1202 = vmatpush.msra.mxu2 %v2778_v11  ;;  %1222 = vmatpush.msra.mxu3 %v2781_v28 }
 0x2c6   :  { %v862_v31 = vpop.f32.mrf.mxu0  ;;  %v882_v19 = vpop.f32.mrf.mxu1 }
 0x2c7   :  { %v925_v32 = vadd.f32 %v862_v31, %v3180_v35  ;;  %v926_v30 = vadd.f32 %v882_v19, %v3181_v18  ;;  %v3183_v18 = vld [vmem:[#allocation48_spill] sm:$0xff] }
 0x2c9   :  { %v1663_v29 = vmul.f32 -1.442695, %v925_v32  ;;  %v1664_v13 = vmul.f32 -1.442695, %v926_v30 }
 0x2cb   :  { %1731 = vpow2.f32 %v1663_v29 }
 0x2cc   :  { %1733 = vpow2.f32 %v1664_v13 }
 0x2cd   :  { %v902_v27 = vpop.f32.mrf.mxu2  ;;  %v922_v28 = vpop.f32.mrf.mxu3 }
 0x2ce   :  { %v927_v24 = vadd.f32 %v902_v27, %v3182_v15  ;;  %v928_v19 = vadd.f32 %v922_v28, %v3183_v18 }
 0x2d0   :  { %v1665_v22 = vmul.f32 -1.442695, %v927_v24 }
 0x2d1   :  { %v1732_v25 = vpop.eup %1731 }
 0x2d2   :  { %v1734_v11 = vpop.eup %1733  ;;  %v938_v36 = vadd.f32 1.0, %v1732_v25  ;;  %1735 = vpow2.f32 %v1665_v22 }
 0x2d3   :  { %v939_v16 = vadd.f32 1.0, %v1734_v11 }
 0x2d4   :  { %1737 = vrcp.f32 %v938_v36  ;;  %v952_v24 = vand.u32 2147483648, %v938_v36  ;;  %v950_v22 = vand.u32 2147483647, %v938_v36  ;;  %vm946_vm7 = vweird.f32 %v938_v36 }
 0x2d5   :  { %1739 = vrcp.f32 %v939_v16  ;;  %v967_v15 = vand.u32 2147483648, %v939_v16  ;;  %v965_v23 = vand.u32 2147483647, %v939_v16  ;;  %vm961_vm8 = vweird.f32 %v939_v16 }
 0x2d6   :  { %v953_v18 = vor.u32 1.1754944e-38, %v952_v24  ;;  %vm951_vm11 = vcmp.eq.f32.partialorder %v950_v22, 8.507059e+37 }
 0x2d7   :  { %vm966_vm12 = vcmp.eq.f32.partialorder %v965_v23, 8.507059e+37 }
 0x2d8   :  { %v1736_v33 = vpop.eup %1735 }
 0x2d9   :  { %v940_v35 = vadd.f32 1.0, %v1736_v33 }
 0x2da   :  { %v1738_v31 = vpop.eup %1737 }
 0x2db   :  { %v1740_v30 = vpop.eup %1739  ;;  %v942_v29 = vmul.f32 %v1738_v31, %v938_v36  ;;  %1741 = vrcp.f32 %v940_v35  ;;  %vm947_vm5 = vweird.f32 %v1738_v31  ;;  %v982_v24 = vand.u32 2147483648, %v940_v35 }
 0x2dc   :  { %v957_v32 = vmul.f32 %v1740_v30, %v939_v16  ;;  %1743 = vtanh.f32 %v928_v19  ;;  %vm962_vm6 = vweird.f32 %v1740_v30  ;;  %vm948_vm9 = vmor %vm946_vm7, %vm947_vm5  ;;  %vm976_vm14 = vweird.f32 %v940_v35 }
 0x2dd   :  { %v943_v13 = vsub.f32 1.0, %v942_v29  ;;  %vm963_vm10 = vmor %vm961_vm8, %vm962_vm6  ;;  %v968_v29 = vor.u32 1.1754944e-38, %v967_v15  ;;  %v983_v22 = vor.u32 1.1754944e-38, %v982_v24  ;;  %v3202_v24 = vld [vmem:[#allocation29_spill] sm:$0xff] }
 0x2de   :  { %v958_v27 = vsub.f32 1.0, %v957_v32 }
 0x2df   :  { %v944_v25 = vmul.f32 %v1738_v31, %v943_v13 }
 0x2e0   :  { %v959_v11 = vmul.f32 %v1740_v30, %v958_v27 }
 0x2e1   :  { %v1742_v26 = vpop.eup %1741  ;;  %v945_v33 = vadd.f32 %v1738_v31, %v944_v25 }
 0x2e2   :  { %v972_v28 = vmul.f32 %v1742_v26, %v940_v35  ;;  %v960_v14 = vadd.f32 %v1740_v30, %v959_v11  ;;  %v1744_v19 = vpop.eup %1743  ;;  %vm977_vm13 = vweird.f32 %v1742_v26  ;;  %v3191_v11 = vld [vmem:[#allocation18_spill] sm:$0xff] }
 0x2e3   :  { %v949_v32 = vsel %vm948_vm9, %v1738_v31, %v945_v33  ;;  %v980_v31 = vand.u32 2147483647, %v940_v35  ;;  %vm978_vm15 = vmor %vm976_vm14, %vm977_vm13  ;;  %v3189_v35 = vld [vmem:[#allocation16_spill] sm:$0xff]  ;;  %v3192_v33 = vld [vmem:[#allocation19_spill] sm:$0xff] }
 0x2e4   :  { %v973_v12 = vsub.f32 1.0, %v972_v28  ;;  %v954_v13 = vsel %vm951_vm11, %v953_v18, %v949_v32  ;;  %v964_v10 = vsel %vm963_vm10, %v1740_v30, %v960_v14  ;;  %v3190_v30 = vld [vmem:[#allocation17_spill] sm:$0xff]  ;;  %v3193_v28 = vld [vmem:[#allocation20_spill] sm:$0xff]  ;;  %v3196_v32 = vld [vmem:[#allocation23_spill] sm:$0xff] }
 0x2e5   :  { %v969_v27 = vsel %vm966_vm12, %v968_v29, %v964_v10  ;;  %v988_v9 = vmul.f32 %v1744_v19, %v954_v13  ;;  %vm981_vm0 = vcmp.eq.f32.partialorder %v980_v31, 8.507059e+37  ;;  %v3194_v18 = vld [vmem:[#allocation21_spill] sm:$0xff]  ;;  %v3195_v29 = vld [vmem:[#allocation22_spill] sm:$0xff]  ;;  %v3197_v19 = vld [vmem:[#allocation24_spill] sm:$0xff] }
 0x2e6   :  { %v987_v21 = vmul.f32 %v969_v27, %v2705_v17  ;;  %v974_v25 = vmul.f32 %v1742_v26, %v973_v12  ;;  %v3184_v17 = vld [vmem:[#allocation11_spill] sm:$0xff]  ;;  %v3187_v12 = vld [vmem:[#allocation14_spill] sm:$0xff]  ;;  %v3198_v13 = vld [vmem:[#allocation25_spill] sm:$0xff] }
 0x2e7   :  { %v3199_v27 = vld [vmem:[#allocation26_spill] sm:$0xff] }
 0x2e8   :  { %v2789_v36 = vadd.f32 %v988_v9, %v987_v21  ;;  %v975_v16 = vadd.f32 %v1742_v26, %v974_v25  ;;  %v3185_v21 = vld [vmem:[#allocation12_spill] sm:$0xff]  ;;  %v3186_v9 = vld [vmem:[#allocation13_spill] sm:$0xff]  ;;  %v3200_v25 = vld [vmem:[#allocation27_spill] sm:$0xff] }
 0x2e9   :  { %v3203_v31 = vld [vmem:[#allocation30_spill] sm:$0xff] }
 0x2ea   :  { %1745 = vtanh.f32 %v2789_v36  ;;  %v979_v15 = vsel %vm978_vm15, %v1742_v26, %v975_v16  ;;  %v3188_v26 = vld [vmem:[#allocation15_spill] sm:$0xff]  ;;  %v3201_v16 = vld [vmem:[#allocation28_spill] sm:$0xff] }
 0x2eb   :  { %v984_v23 = vsel %vm981_vm0, %v983_v22, %v979_v15  ;;  %v3204_v15 = vld [vmem:[#allocation31_spill] sm:$0xff]  ;;  %v3205_v22 = vld [vmem:[#allocation32_spill] sm:$0xff] }
 0x2f0   :  { %v1746_v14 = vpop.eup %1745 }
 0x2f1   :  { %v991_v10 = vmul.f32 %v1746_v14, %v984_v23  ;;  %v3206_v14 = vld [vmem:[#allocation33_spill] sm:$0xff]  ;;  %v3207_v23 = vld [vmem:[#allocation34_spill] sm:$0xff] }
 0x2f3   :  { %1012 = vmatmul.f32.vlgmr.msrb.gmra.mxu0 %v991_v10  ;;  %1032 = vmatmul.f32.vlgmr.msrb.gmra.mxu1 %v991_v10 }
 0x2f4   :  { %1052 = vmatmul.f32.vlgmr.msrb.gmra.mxu2 %v991_v10  ;;  %1072 = vmatmul.f32.vlgmr.msrb.gmra.mxu3 %v991_v10  ;;  %v3208_v10 = vld [vmem:[#allocation35_spill] sm:$0xff] }
 0x2f5   :  { %1298 = vmatpush.msrb.mxu0 %v2520_v4  ;;  %1318 = vmatpush.msrb.mxu1 %v2523_v37 }
 0x2f6   :  { %1338 = vmatpush.msrb.mxu2 %v2526_v38  ;;  %1358 = vmatpush.msrb.mxu3 %v2529_v39 }
 0x2f7   :  { %1299 = vmatpush.msrb.mxu0 %v2532_v40  ;;  %1319 = vmatpush.msrb.mxu1 %v2535_v41 }
 0x2f8   :  { %1339 = vmatpush.msrb.mxu2 %v2538_v42  ;;  %1359 = vmatpush.msrb.mxu3 %v2541_v43 }
 0x2f9   :  { %1300 = vmatpush.msrb.mxu0 %v2544_v44  ;;  %1320 = vmatpush.msrb.mxu1 %v2547_v45 }
 0x2fa   :  { %1340 = vmatpush.msrb.mxu2 %v2550_v46  ;;  %1360 = vmatpush.msrb.mxu3 %v2553_v48 }
 0x2fb   :  { %1301 = vmatpush.msrb.mxu0 %v2556_v49  ;;  %1321 = vmatpush.msrb.mxu1 %v2559_v50 }
 0x2fc   :  { %1341 = vmatpush.msrb.mxu2 %v2562_v51  ;;  %1361 = vmatpush.msrb.mxu3 %v2565_v8 }
 0x2fd   :  { %1302 = vmatpush.msrb.mxu0 %v2568_v61  ;;  %1322 = vmatpush.msrb.mxu1 %v2571_v5 }
 0x2fe   :  { %1342 = vmatpush.msrb.mxu2 %v2574_v53  ;;  %1362 = vmatpush.msrb.mxu3 %v2577_v57 }
 0x2ff   :  { %1303 = vmatpush.msrb.mxu0 %v2580_v3  ;;  %1323 = vmatpush.msrb.mxu1 %v2583_v7 }
 0x300   :  { %1343 = vmatpush.msrb.mxu2 %v2586_v56  ;;  %1363 = vmatpush.msrb.mxu3 %v2589_v34 }
 0x301   :  { %1304 = vmatpush.msrb.mxu0 %v2592_v58  ;;  %1324 = vmatpush.msrb.mxu1 %v2595_v52 }
 0x302   :  { %1344 = vmatpush.msrb.mxu2 %v2598_v59  ;;  %1364 = vmatpush.msrb.mxu3 %v2601_v60 }
 0x303   :  { %1305 = vmatpush.msrb.mxu0 %v2604_v63  ;;  %1325 = vmatpush.msrb.mxu1 %v2607_v0 }
 0x304   :  { %1345 = vmatpush.msrb.mxu2 %v2610_v47  ;;  %1365 = vmatpush.msrb.mxu3 %v2613_v55 }
 0x305   :  { %1306 = vmatpush.msrb.mxu0 %v2616_v62  ;;  %1326 = vmatpush.msrb.mxu1 %v2619_v54 }
 0x306   :  { %1346 = vmatpush.msrb.mxu2 %v2622_v2  ;;  %1366 = vmatpush.msrb.mxu3 %v2625_v6 }
 0x307   :  { %1307 = vmatpush.msrb.mxu0 %v2628_v1  ;;  %1327 = vmatpush.msrb.mxu1 %v2631_v20 }
 0x308   :  { %1347 = vmatpush.msrb.mxu2 %v3184_v17  ;;  %1367 = vmatpush.msrb.mxu3 %v3185_v21 }
 0x309   :  { %1308 = vmatpush.msrb.mxu0 %v3186_v9  ;;  %1328 = vmatpush.msrb.mxu1 %v3187_v12 }
 0x30a   :  { %1348 = vmatpush.msrb.mxu2 %v3188_v26  ;;  %1368 = vmatpush.msrb.mxu3 %v3189_v35 }
 0x30b   :  { %1309 = vmatpush.msrb.mxu0 %v3190_v30  ;;  %1329 = vmatpush.msrb.mxu1 %v3191_v11 }
 0x30c   :  { %1349 = vmatpush.msrb.mxu2 %v3192_v33  ;;  %1369 = vmatpush.msrb.mxu3 %v3193_v28 }
 0x30d   :  { %1310 = vmatpush.msrb.mxu0 %v3194_v18  ;;  %1330 = vmatpush.msrb.mxu1 %v3195_v29 }
 0x30e   :  { %1350 = vmatpush.msrb.mxu2 %v3196_v32  ;;  %1370 = vmatpush.msrb.mxu3 %v3197_v19  ;;  %v3210_v19 = vld [vmem:[#allocation49_spill] sm:$0xff]  ;;  %v3211_v32 = vld [vmem:[#allocation50_spill] sm:$0xff] }
 0x30f   :  { %1311 = vmatpush.msrb.mxu0 %v3198_v13  ;;  %1331 = vmatpush.msrb.mxu1 %v3199_v27  ;;  %v3209_v13 = vld [vmem:[#allocation36_spill] sm:$0xff] }
 0x310   :  { %1351 = vmatpush.msrb.mxu2 %v3200_v25  ;;  %1371 = vmatpush.msrb.mxu3 %v3201_v16 }
 0x311   :  { %1312 = vmatpush.msrb.mxu0 %v3202_v24  ;;  %1332 = vmatpush.msrb.mxu1 %v3203_v31 }
 0x312   :  { %1352 = vmatpush.msrb.mxu2 %v3204_v15  ;;  %1372 = vmatpush.msrb.mxu3 %v3205_v22  ;;  %v3212_v22 = vld [vmem:[#allocation51_spill] sm:$0xff] }
 0x313   :  { %1313 = vmatpush.msrb.mxu0 %v3206_v14  ;;  %1333 = vmatpush.msrb.mxu1 %v3207_v23 }
 0x314   :  { %1353 = vmatpush.msrb.mxu2 %v3208_v10  ;;  %1373 = vmatpush.msrb.mxu3 %v3209_v13 }
 0x370   :  { %v1013_v27 = vpop.f32.mrf.mxu0  ;;  %v1033_v25 = vpop.f32.mrf.mxu1 }
 0x371   :  { %v1076_v16 = vadd.f32 %v1013_v27, %v3210_v19  ;;  %v1077_v24 = vadd.f32 %v1033_v25, %v3211_v32  ;;  %v3213_v32 = vld [vmem:[#allocation52_spill] sm:$0xff] }
 0x373   :  { %v1666_v29 = vmul.f32 -1.442695, %v1076_v16  ;;  %v1667_v31 = vmul.f32 -1.442695, %v1077_v24 }
 0x375   :  { %1747 = vpow2.f32 %v1666_v29 }
 0x376   :  { %1749 = vpow2.f32 %v1667_v31 }
 0x377   :  { %v1053_v15 = vpop.f32.mrf.mxu2  ;;  %v1073_v13 = vpop.f32.mrf.mxu3 }
 0x378   :  { %v1078_v18 = vadd.f32 %v1053_v15, %v3212_v22  ;;  %v1079_v25 = vadd.f32 %v1073_v13, %v3213_v32 }
 0x37a   :  { %v1668_v14 = vmul.f32 -1.442695, %v1078_v18 }
 0x37b   :  { %v1748_v28 = vpop.eup %1747 }
 0x37c   :  { %v1750_v23 = vpop.eup %1749  ;;  %v1089_v33 = vadd.f32 1.0, %v1748_v28  ;;  %1751 = vpow2.f32 %v1668_v14 }
 0x37d   :  { %v1090_v10 = vadd.f32 1.0, %v1750_v23 }
 0x37e   :  { %1753 = vrcp.f32 %v1089_v33  ;;  %v1103_v18 = vand.u32 2147483648, %v1089_v33  ;;  %v1101_v14 = vand.u32 2147483647, %v1089_v33  ;;  %vm1097_vm3 = vweird.f32 %v1089_v33 }
 0x37f   :  { %1755 = vrcp.f32 %v1090_v10  ;;  %v1118_v22 = vand.u32 2147483648, %v1090_v10  ;;  %v1116_v30 = vand.u32 2147483647, %v1090_v10  ;;  %vm1112_vm4 = vweird.f32 %v1090_v10 }
 0x380   :  { %v1104_v32 = vor.u32 1.1754944e-38, %v1103_v18  ;;  %vm1102_vm7 = vcmp.eq.f32.partialorder %v1101_v14, 8.507059e+37 }
 0x381   :  { %vm1117_vm8 = vcmp.eq.f32.partialorder %v1116_v30, 8.507059e+37 }
 0x382   :  { %v1752_v11 = vpop.eup %1751 }
 0x383   :  { %v1091_v19 = vadd.f32 1.0, %v1752_v11 }
 0x384   :  { %v1754_v27 = vpop.eup %1753 }
 0x385   :  { %v1756_v16 = vpop.eup %1755  ;;  %v1093_v29 = vmul.f32 %v1754_v27, %v1089_v33  ;;  %1757 = vrcp.f32 %v1091_v19  ;;  %vm1098_vm1 = vweird.f32 %v1754_v27  ;;  %v1133_v18 = vand.u32 2147483648, %v1091_v19 }
 0x386   :  { %v1108_v24 = vmul.f32 %v1756_v16, %v1090_v10  ;;  %1759 = vtanh.f32 %v1079_v25  ;;  %vm1113_vm2 = vweird.f32 %v1756_v16  ;;  %vm1099_vm5 = vmor %vm1097_vm3, %vm1098_vm1  ;;  %vm1127_vm10 = vweird.f32 %v1091_v19 }
 0x387   :  { %v1094_v31 = vsub.f32 1.0, %v1093_v29  ;;  %vm1114_vm6 = vmor %vm1112_vm4, %vm1113_vm2  ;;  %v1119_v29 = vor.u32 1.1754944e-38, %v1118_v22  ;;  %v1134_v14 = vor.u32 1.1754944e-38, %v1133_v18 }
 0x388   :  { %v1109_v15 = vsub.f32 1.0, %v1108_v24 }
 0x389   :  { %v1095_v28 = vmul.f32 %v1754_v27, %v1094_v31 }
 0x38a   :  { %v1110_v23 = vmul.f32 %v1756_v16, %v1109_v15 }
 0x38b   :  { %v1758_v35 = vpop.eup %1757  ;;  %v1096_v11 = vadd.f32 %v1754_v27, %v1095_v28 }
 0x38c   :  { %v1123_v13 = vmul.f32 %v1758_v35, %v1091_v19  ;;  %v1111_v26 = vadd.f32 %v1756_v16, %v1110_v23  ;;  %v1760_v25 = vpop.eup %1759  ;;  %vm1128_vm9 = vweird.f32 %v1758_v35 }
 0x38d   :  { %v1100_v24 = vsel %vm1099_vm5, %v1754_v27, %v1096_v11  ;;  %v1131_v27 = vand.u32 2147483647, %v1091_v19  ;;  %vm1129_vm11 = vmor %vm1127_vm10, %vm1128_vm9  ;;  %v3243_v11 = vld [vmem:[#allocation56_spill] sm:$0xff] }
 0x38e   :  { %v1124_v12 = vsub.f32 1.0, %v1123_v13  ;;  %v1105_v31 = vsel %vm1102_vm7, %v1104_v32, %v1100_v24  ;;  %v1115_v9 = vsel %vm1114_vm6, %v1756_v16, %v1111_v26 }
 0x38f   :  { %v1120_v15 = vsel %vm1117_vm8, %v1119_v29, %v1115_v9  ;;  %v1139_v21 = vmul.f32 %v1760_v25, %v1105_v31  ;;  %vm1132_vm12 = vcmp.eq.f32.partialorder %v1131_v27, 8.507059e+37 }
 0x390   :  { %v1138_v17 = vmul.f32 %v1120_v15, %v2789_v36  ;;  %v1125_v28 = vmul.f32 %v1758_v35, %v1124_v12 }
 0x392   :  { %v2861_v33 = vadd.f32 %v1139_v21, %v1138_v17  ;;  %v1126_v10 = vadd.f32 %v1758_v35, %v1125_v28 }
 0x394   :  { %1761 = vtanh.f32 %v2861_v33  ;;  %v1130_v22 = vsel %vm1129_vm11, %v1758_v35, %v1126_v10 }
 0x395   :  { %v1135_v30 = vsel %vm1132_vm12, %v1134_v14, %v1130_v22 }
 0x39a   :  { %v1762_v26 = vpop.eup %1761 }
 0x39b   :  { %v1142_v9 = vmul.f32 %v1762_v26, %v1135_v30 }
 0x39d   :  { %1163 = vmatmul.f32.vlgmr.msra.gmra.mxu0 %v1142_v9  ;;  %1183 = vmatmul.f32.vlgmr.msra.gmra.mxu1 %v1142_v9 }
 0x39e   :  { %1203 = vmatmul.f32.vlgmr.msra.gmra.mxu2 %v1142_v9  ;;  %1223 = vmatmul.f32.vlgmr.msra.gmra.mxu3 %v1142_v9 }
 0x39f   :  { %1449 = vmatpush.msra.mxu0 %v2520_v4  ;;  %1469 = vmatpush.msra.mxu1 %v2523_v37  ;;  %v3214_v4 = vld [vmem:[#allocation11_spill] sm:$0xff]  ;;  %v3215_v37 = vld [vmem:[#allocation12_spill] sm:$0xff] }
 0x3a0   :  { %1489 = vmatpush.msra.mxu2 %v2526_v38  ;;  %1509 = vmatpush.msra.mxu3 %v2529_v39  ;;  %v3216_v38 = vld [vmem:[#allocation13_spill] sm:$0xff]  ;;  %v3217_v39 = vld [vmem:[#allocation14_spill] sm:$0xff] }
 0x3a1   :  { %1450 = vmatpush.msra.mxu0 %v2532_v40  ;;  %1470 = vmatpush.msra.mxu1 %v2535_v41  ;;  %v3218_v40 = vld [vmem:[#allocation15_spill] sm:$0xff]  ;;  %v3219_v41 = vld [vmem:[#allocation16_spill] sm:$0xff] }
 0x3a2   :  { %1490 = vmatpush.msra.mxu2 %v2538_v42  ;;  %1510 = vmatpush.msra.mxu3 %v2541_v43  ;;  %v3220_v42 = vld [vmem:[#allocation17_spill] sm:$0xff]  ;;  %v3221_v43 = vld [vmem:[#allocation18_spill] sm:$0xff] }
 0x3a3   :  { %1451 = vmatpush.msra.mxu0 %v2544_v44  ;;  %1471 = vmatpush.msra.mxu1 %v2547_v45  ;;  %v3222_v44 = vld [vmem:[#allocation19_spill] sm:$0xff]  ;;  %v3223_v45 = vld [vmem:[#allocation20_spill] sm:$0xff] }
 0x3a4   :  { %1491 = vmatpush.msra.mxu2 %v2550_v46  ;;  %1511 = vmatpush.msra.mxu3 %v2553_v48  ;;  %v3224_v46 = vld [vmem:[#allocation21_spill] sm:$0xff]  ;;  %v3225_v48 = vld [vmem:[#allocation22_spill] sm:$0xff] }
 0x3a5   :  { %1452 = vmatpush.msra.mxu0 %v2556_v49  ;;  %1472 = vmatpush.msra.mxu1 %v2559_v50  ;;  %v3226_v49 = vld [vmem:[#allocation23_spill] sm:$0xff]  ;;  %v3227_v50 = vld [vmem:[#allocation24_spill] sm:$0xff] }
 0x3a6   :  { %1492 = vmatpush.msra.mxu2 %v2562_v51  ;;  %1512 = vmatpush.msra.mxu3 %v2565_v8  ;;  %v3228_v51 = vld [vmem:[#allocation25_spill] sm:$0xff]  ;;  %v3229_v8 = vld [vmem:[#allocation26_spill] sm:$0xff] }
 0x3a7   :  { %1453 = vmatpush.msra.mxu0 %v2568_v61  ;;  %1473 = vmatpush.msra.mxu1 %v2571_v5  ;;  %v3230_v61 = vld [vmem:[#allocation27_spill] sm:$0xff]  ;;  %v3231_v5 = vld [vmem:[#allocation28_spill] sm:$0xff] }
 0x3a8   :  { %1493 = vmatpush.msra.mxu2 %v2574_v53  ;;  %1513 = vmatpush.msra.mxu3 %v2577_v57  ;;  %v3232_v53 = vld [vmem:[#allocation29_spill] sm:$0xff]  ;;  %v3233_v57 = vld [vmem:[#allocation30_spill] sm:$0xff] }
 0x3a9   :  { %1454 = vmatpush.msra.mxu0 %v2580_v3  ;;  %1474 = vmatpush.msra.mxu1 %v2583_v7  ;;  %v3234_v3 = vld [vmem:[#allocation31_spill] sm:$0xff]  ;;  %v3235_v7 = vld [vmem:[#allocation32_spill] sm:$0xff] }
 0x3aa   :  { %1494 = vmatpush.msra.mxu2 %v2586_v56  ;;  %1514 = vmatpush.msra.mxu3 %v2589_v34  ;;  %v3236_v56 = vld [vmem:[#allocation33_spill] sm:$0xff]  ;;  %v3237_v34 = vld [vmem:[#allocation34_spill] sm:$0xff] }
 0x3ab   :  { %1455 = vmatpush.msra.mxu0 %v2592_v58  ;;  %1475 = vmatpush.msra.mxu1 %v2595_v52  ;;  %v3238_v58 = vld [vmem:[#allocation35_spill] sm:$0xff]  ;;  %v3239_v52 = vld [vmem:[#allocation36_spill] sm:$0xff] }
 0x3ac   :  { %1495 = vmatpush.msra.mxu2 %v2598_v59  ;;  %1515 = vmatpush.msra.mxu3 %v2601_v60 }
 0x3ad   :  { %1456 = vmatpush.msra.mxu0 %v2604_v63  ;;  %1476 = vmatpush.msra.mxu1 %v2607_v0  ;;  %v3240_v63 = vld [vmem:[#allocation53_spill] sm:$0xff] }
 0x3ae   :  { %1496 = vmatpush.msra.mxu2 %v2610_v47  ;;  %1516 = vmatpush.msra.mxu3 %v2613_v55  ;;  %v3241_v47 = vld [vmem:[#allocation54_spill] sm:$0xff] }
 0x3af   :  { %1457 = vmatpush.msra.mxu0 %v2616_v62  ;;  %1477 = vmatpush.msra.mxu1 %v2619_v54 }
 0x3b0   :  { %1497 = vmatpush.msra.mxu2 %v2622_v2  ;;  %1517 = vmatpush.msra.mxu3 %v2625_v6  ;;  %v3242_v6 = vld [vmem:[#allocation55_spill] sm:$0xff] }
 0x3b1   :  { %1458 = vmatpush.msra.mxu0 %v2628_v1  ;;  %1478 = vmatpush.msra.mxu1 %v2631_v20 }
 0x3b2   :  { %1498 = vmatpush.msra.mxu2 %v3214_v4  ;;  %1518 = vmatpush.msra.mxu3 %v3215_v37 }
 0x3b3   :  { %1459 = vmatpush.msra.mxu0 %v3216_v38  ;;  %1479 = vmatpush.msra.mxu1 %v3217_v39 }
 0x3b4   :  { %1499 = vmatpush.msra.mxu2 %v3218_v40  ;;  %1519 = vmatpush.msra.mxu3 %v3219_v41 }
 0x3b5   :  { %1460 = vmatpush.msra.mxu0 %v3220_v42  ;;  %1480 = vmatpush.msra.mxu1 %v3221_v43 }
 0x3b6   :  { %1500 = vmatpush.msra.mxu2 %v3222_v44  ;;  %1520 = vmatpush.msra.mxu3 %v3223_v45 }
 0x3b7   :  { %1461 = vmatpush.msra.mxu0 %v3224_v46  ;;  %1481 = vmatpush.msra.mxu1 %v3225_v48 }
 0x3b8   :  { %1501 = vmatpush.msra.mxu2 %v3226_v49  ;;  %1521 = vmatpush.msra.mxu3 %v3227_v50 }
 0x3b9   :  { %1462 = vmatpush.msra.mxu0 %v3228_v51  ;;  %1482 = vmatpush.msra.mxu1 %v3229_v8 }
 0x3ba   :  { %1502 = vmatpush.msra.mxu2 %v3230_v61  ;;  %1522 = vmatpush.msra.mxu3 %v3231_v5 }
 0x3bb   :  { %1463 = vmatpush.msra.mxu0 %v3232_v53  ;;  %1483 = vmatpush.msra.mxu1 %v3233_v57 }
 0x3bc   :  { %1503 = vmatpush.msra.mxu2 %v3234_v3  ;;  %1523 = vmatpush.msra.mxu3 %v3235_v7  ;;  %v3244_v7 = vld [vmem:[#allocation57_spill] sm:$0xff] }
 0x3bd   :  { %1464 = vmatpush.msra.mxu0 %v3236_v56  ;;  %1484 = vmatpush.msra.mxu1 %v3237_v34  ;;  %v3245_v34 = vld [vmem:[#allocation58_spill] sm:$0xff] }
 0x3be   :  { %1504 = vmatpush.msra.mxu2 %v3238_v58  ;;  %1524 = vmatpush.msra.mxu3 %v3239_v52 }
 0x41a   :  { %v1164_v59 = vpop.f32.mrf.mxu0  ;;  %v1184_v60 = vpop.f32.mrf.mxu1 }
 0x41b   :  { %v1227_v0 = vadd.f32 %v1164_v59, %v3240_v63  ;;  %v1228_v55 = vadd.f32 %v1184_v60, %v3241_v47  ;;  %v3246_v63 = vld [vmem:[#allocation59_spill] sm:$0xff] }
 0x41d   :  { %v1669_v62 = vmul.f32 -1.442695, %v1227_v0  ;;  %v1670_v54 = vmul.f32 -1.442695, %v1228_v55 }
 0x41f   :  { %1763 = vpow2.f32 %v1669_v62 }
 0x420   :  { %1765 = vpow2.f32 %v1670_v54 }
 0x421   :  { %v1204_v2 = vpop.f32.mrf.mxu2  ;;  %v1224_v35 = vpop.f32.mrf.mxu3 }
 0x422   :  { %v1229_v1 = vadd.f32 %v1204_v2, %v3242_v6  ;;  %v1230_v13 = vadd.f32 %v1224_v35, %v3243_v11 }
 0x424   :  { %v1671_v20 = vmul.f32 -1.442695, %v1229_v1 }
 0x425   :  { %v1764_v36 = vpop.eup %1763 }
 0x426   :  { %v1766_v17 = vpop.eup %1765  ;;  %v1240_v21 = vadd.f32 1.0, %v1764_v36  ;;  %1767 = vpow2.f32 %v1671_v20 }
 0x427   :  { %v1241_v12 = vadd.f32 1.0, %v1766_v17  ;;  %v3247_v17 = vld [vmem:[#allocation60_spill] sm:$0xff] }
 0x428   :  { %1769 = vrcp.f32 %v1240_v21  ;;  %v1254_v15 = vand.u32 2147483648, %v1240_v21  ;;  %v1252_v18 = vand.u32 2147483647, %v1240_v21  ;;  %vm1248_vm15 = vweird.f32 %v1240_v21 }
 0x429   :  { %1771 = vrcp.f32 %v1241_v12  ;;  %v1269_v28 = vand.u32 2147483648, %v1241_v12  ;;  %v1267_v22 = vand.u32 2147483647, %v1241_v12  ;;  %vm1263_vm0 = vweird.f32 %v1241_v12 }
 0x42a   :  { %v1255_v9 = vor.u32 1.1754944e-38, %v1254_v15  ;;  %vm1253_vm3 = vcmp.eq.f32.partialorder %v1252_v18, 8.507059e+37 }
 0x42b   :  { %v1270_v37 = vor.u32 1.1754944e-38, %v1269_v28  ;;  %vm1268_vm4 = vcmp.eq.f32.partialorder %v1267_v22, 8.507059e+37 }
 0x42c   :  { %v1768_v19 = vpop.eup %1767 }
 0x42d   :  { %v1242_v16 = vadd.f32 1.0, %v1768_v19 }
 0x42e   :  { %v1770_v23 = vpop.eup %1769 }
 0x42f   :  { %v1772_v32 = vpop.eup %1771  ;;  %v1244_v29 = vmul.f32 %v1770_v23, %v1240_v21  ;;  %1773 = vrcp.f32 %v1242_v16  ;;  %vm1249_vm13 = vweird.f32 %v1770_v23  ;;  %v1284_v50 = vand.u32 2147483648, %v1242_v16 }
 0x430   :  { %v1259_v24 = vmul.f32 %v1772_v32, %v1241_v12  ;;  %1775 = vtanh.f32 %v1230_v13  ;;  %vm1264_vm14 = vweird.f32 %v1772_v32  ;;  %vm1250_vm1 = vmor %vm1248_vm15, %vm1249_vm13  ;;  %vm1278_vm6 = vweird.f32 %v1242_v16 }
 0x431   :  { %v1245_v25 = vsub.f32 1.0, %v1244_v29  ;;  %vm1265_vm2 = vmor %vm1263_vm0, %vm1264_vm14  ;;  %v1282_v51 = vand.u32 2147483647, %v1242_v16  ;;  %v1285_v61 = vor.u32 1.1754944e-38, %v1284_v50 }
 0x432   :  { %v1260_v31 = vsub.f32 1.0, %v1259_v24 }
 0x433   :  { %v1246_v10 = vmul.f32 %v1770_v23, %v1245_v25  ;;  %vm1283_vm8 = vcmp.eq.f32.partialorder %v1282_v51, 8.507059e+37 }
 0x434   :  { %v1261_v27 = vmul.f32 %v1772_v32, %v1260_v31 }
 0x435   :  { %v1774_v14 = vpop.eup %1773  ;;  %v1247_v26 = vadd.f32 %v1770_v23, %v1246_v10 }
 0x436   :  { %v1274_v30 = vmul.f32 %v1774_v14, %v1242_v16  ;;  %v1262_v4 = vadd.f32 %v1772_v32, %v1261_v27  ;;  %v1776_v39 = vpop.eup %1775  ;;  %vm1279_vm5 = vweird.f32 %v1774_v14 }
 0x437   :  { %v1251_v38 = vsel %vm1250_vm1, %v1770_v23, %v1247_v26  ;;  %vm1280_vm7 = vmor %vm1278_vm6, %vm1279_vm5 }
 0x438   :  { %v1275_v40 = vsub.f32 1.0, %v1274_v30  ;;  %v1256_v41 = vsel %vm1253_vm3, %v1255_v9, %v1251_v38  ;;  %v1266_v42 = vsel %vm1265_vm2, %v1772_v32, %v1262_v4 }
 0x439   :  { %v1271_v43 = vsel %vm1268_vm4, %v1270_v37, %v1266_v42  ;;  %v1290_v44 = vmul.f32 %v1776_v39, %v1256_v41 }
 0x43a   :  { %v1289_v45 = vmul.f32 %v1271_v43, %v2861_v33  ;;  %v1276_v46 = vmul.f32 %v1774_v14, %v1275_v40 }
 0x43c   :  { %v2933_v48 = vadd.f32 %v1290_v44, %v1289_v45  ;;  %v1277_v49 = vadd.f32 %v1774_v14, %v1276_v46 }
 0x43e   :  { %1777 = vtanh.f32 %v2933_v48  ;;  %v1281_v8 = vsel %vm1280_vm7, %v1774_v14, %v1277_v49 }
 0x43f   :  { %v1286_v53 = vsel %vm1283_vm8, %v1285_v61, %v1281_v8  ;;  %v3248_v8 = vld [vmem:[#allocation61_spill] sm:$0xff] }
 0x444   :  { %v1778_v5 = vpop.eup %1777 }
 0x445   :  { %v1293_v57 = vmul.f32 %v1778_v5, %v1286_v53  ;;  %v3249_v5 = vld [vmem:[#allocation62_spill] sm:$0xff] }
 0x447   :  { %1314 = vmatmul.f32.vlgmr.msrb.gmra.mxu0 %v1293_v57  ;;  %1334 = vmatmul.f32.vlgmr.msrb.gmra.mxu1 %v1293_v57 }
 0x448   :  { %1354 = vmatmul.f32.vlgmr.msrb.gmra.mxu2 %v1293_v57  ;;  %1374 = vmatmul.f32.vlgmr.msrb.gmra.mxu3 %v1293_v57 }
 0x4c4   :  { %v1315_v33 = vpop.f32.mrf.mxu0  ;;  %v1335_v3 = vpop.f32.mrf.mxu1 }
 0x4c5   :  { %v1378_v56 = vadd.f32 %v1315_v33, %v3244_v7  ;;  %v1379_v58 = vadd.f32 %v1335_v3, %v3245_v34  ;;  %v3250_v7 = vld [vmem:[#allocation63_spill] sm:$0xff] }
 0x4c7   :  { %v1672_v52 = vmul.f32 -1.442695, %v1378_v56  ;;  %v1673_v59 = vmul.f32 -1.442695, %v1379_v58 }
 0x4c9   :  { %1779 = vpow2.f32 %v1672_v52 }
 0x4ca   :  { %1781 = vpow2.f32 %v1673_v59 }
 0x4cb   :  { %v1355_v60 = vpop.f32.mrf.mxu2  ;;  %v1375_v6 = vpop.f32.mrf.mxu3 }
 0x4cc   :  { %v1380_v0 = vadd.f32 %v1355_v60, %v3246_v63  ;;  %v1381_v21 = vadd.f32 %v1375_v6, %v3247_v17 }
 0x4ce   :  { %v1674_v47 = vmul.f32 -1.442695, %v1380_v0 }
 0x4cf   :  { %v1780_v55 = vpop.eup %1779 }
 0x4d0   :  { %v1782_v62 = vpop.eup %1781  ;;  %v1391_v54 = vadd.f32 1.0, %v1780_v55  ;;  %1783 = vpow2.f32 %v1674_v47 }
 0x4d1   :  { %v1392_v2 = vadd.f32 1.0, %v1782_v62  ;;  %v3251_v62 = vld [vmem:[#allocation64_spill] sm:$0xff] }
 0x4d2   :  { %1785 = vrcp.f32 %v1391_v54  ;;  %v1405_v11 = vand.u32 2147483648, %v1391_v54  ;;  %v1403_v29 = vand.u32 2147483647, %v1391_v54  ;;  %vm1399_vm11 = vweird.f32 %v1391_v54 }
 0x4d3   :  { %1787 = vrcp.f32 %v1392_v2  ;;  %v1420_v13 = vand.u32 2147483648, %v1392_v2  ;;  %v1418_v25 = vand.u32 2147483647, %v1392_v2  ;;  %vm1414_vm12 = vweird.f32 %v1392_v2 }
 0x4d4   :  { %v1406_v10 = vor.u32 1.1754944e-38, %v1405_v11  ;;  %vm1404_vm15 = vcmp.eq.f32.partialorder %v1403_v29, 8.507059e+37 }
 0x4d5   :  { %v1421_v27 = vor.u32 1.1754944e-38, %v1420_v13  ;;  %vm1419_vm0 = vcmp.eq.f32.partialorder %v1418_v25, 8.507059e+37 }
 0x4d6   :  { %v1784_v1 = vpop.eup %1783 }
 0x4d7   :  { %v1393_v20 = vadd.f32 1.0, %v1784_v1 }
 0x4d8   :  { %v1786_v36 = vpop.eup %1785 }
 0x4d9   :  { %v1788_v12 = vpop.eup %1787  ;;  %v1395_v35 = vmul.f32 %v1786_v36, %v1391_v54  ;;  %1789 = vrcp.f32 %v1393_v20  ;;  %vm1400_vm9 = vweird.f32 %v1786_v36  ;;  %v1435_v42 = vand.u32 2147483648, %v1393_v20 }
 0x4da   :  { %v1410_v19 = vmul.f32 %v1788_v12, %v1392_v2  ;;  %1791 = vtanh.f32 %v1381_v21  ;;  %vm1415_vm10 = vweird.f32 %v1788_v12  ;;  %vm1401_vm13 = vmor %vm1399_vm11, %vm1400_vm9  ;;  %vm1429_vm2 = vweird.f32 %v1393_v20 }
 0x4db   :  { %v1396_v16 = vsub.f32 1.0, %v1395_v35  ;;  %vm1416_vm14 = vmor %vm1414_vm12, %vm1415_vm10  ;;  %v1433_v43 = vand.u32 2147483647, %v1393_v20  ;;  %v1436_v45 = vor.u32 1.1754944e-38, %v1435_v42 }
 0x4dc   :  { %v1411_v23 = vsub.f32 1.0, %v1410_v19 }
 0x4dd   :  { %v1397_v32 = vmul.f32 %v1786_v36, %v1396_v16  ;;  %vm1434_vm4 = vcmp.eq.f32.partialorder %v1433_v43, 8.507059e+37 }
 0x4de   :  { %v1412_v24 = vmul.f32 %v1788_v12, %v1411_v23 }
 0x4df   :  { %v1790_v31 = vpop.eup %1789  ;;  %v1398_v15 = vadd.f32 %v1786_v36, %v1397_v32 }
 0x4e0   :  { %v1425_v28 = vmul.f32 %v1790_v31, %v1393_v20  ;;  %v1413_v18 = vadd.f32 %v1788_v12, %v1412_v24  ;;  %v1792_v14 = vpop.eup %1791  ;;  %vm1430_vm1 = vweird.f32 %v1790_v31 }
 0x4e1   :  { %v1402_v22 = vsel %vm1401_vm13, %v1786_v36, %v1398_v15  ;;  %vm1431_vm3 = vmor %vm1429_vm2, %vm1430_vm1 }
 0x4e2   :  { %v1426_v26 = vsub.f32 1.0, %v1425_v28  ;;  %v1407_v30 = vsel %vm1404_vm15, %v1406_v10, %v1402_v22  ;;  %v1417_v9 = vsel %vm1416_vm14, %v1788_v12, %v1413_v18 }
 0x4e3   :  { %v1422_v4 = vsel %vm1419_vm0, %v1421_v27, %v1417_v9  ;;  %v1441_v37 = vmul.f32 %v1792_v14, %v1407_v30 }
 0x4e4   :  { %v1440_v38 = vmul.f32 %v1422_v4, %v2933_v48  ;;  %v1427_v39 = vmul.f32 %v1790_v31, %v1426_v26 }
 0x4e6   :  { %v2941_v40 = vadd.f32 %v1441_v37, %v1440_v38  ;;  %v1428_v41 = vadd.f32 %v1790_v31, %v1427_v39 }
 0x4e8   :  { %1793 = vtanh.f32 %v2941_v40  ;;  %v1432_v44 = vsel %vm1431_vm3, %v1790_v31, %v1428_v41 }
 0x4e9   :  { %v1437_v49 = vsel %vm1434_vm4, %v1436_v45, %v1432_v44 }
 0x4ee   :  { %v1794_v46 = vpop.eup %1793 }
 0x4ef   :  { %v1444_v50 = vmul.f32 %v1794_v46, %v1437_v49 }
 0x4f1   :  { %1465 = vmatmul.f32.vlgmr.msra.gmra.mxu0 %v1444_v50  ;;  %1485 = vmatmul.f32.vlgmr.msra.gmra.mxu1 %v1444_v50 }
 0x4f2   :  { %1505 = vmatmul.f32.vlgmr.msra.gmra.mxu2 %v1444_v50  ;;  %1525 = vmatmul.f32.vlgmr.msra.gmra.mxu3 %v1444_v50 }
 0x56e   :  { %v1466_v48 = vpop.f32.mrf.mxu0  ;;  %v1486_v51 = vpop.f32.mrf.mxu1 }
 0x56f   :  { %v1529_v61 = vadd.f32 %v1466_v48, %v3248_v8  ;;  %v1530_v53 = vadd.f32 %v1486_v51, %v3249_v5 }
 0x571   :  { %v1675_v57 = vmul.f32 -1.442695, %v1529_v61  ;;  %v1676_v33 = vmul.f32 -1.442695, %v1530_v53 }
 0x573   :  { %1795 = vpow2.f32 %v1675_v57 }
 0x574   :  { %1797 = vpow2.f32 %v1676_v33 }
 0x575   :  { %v1506_v3 = vpop.f32.mrf.mxu2  ;;  %v1526_v63 = vpop.f32.mrf.mxu3 }
 0x576   :  { %v1531_v56 = vadd.f32 %v1506_v3, %v3250_v7  ;;  %v1532_v54 = vadd.f32 %v1526_v63, %v3251_v62 }
 0x578   :  { %v1677_v34 = vmul.f32 -1.442695, %v1531_v56 }
 0x579   :  { %v1796_v58 = vpop.eup %1795 }
 0x57a   :  { %v1798_v52 = vpop.eup %1797  ;;  %v1542_v59 = vadd.f32 1.0, %v1796_v58  ;;  %1799 = vpow2.f32 %v1677_v34 }
 0x57b   :  { %v1543_v60 = vadd.f32 1.0, %v1798_v52 }
 0x57c   :  { %1801 = vrcp.f32 %v1542_v59  ;;  %v1556_v17 = vand.u32 2147483648, %v1542_v59  ;;  %v1554_v35 = vand.u32 2147483647, %v1542_v59  ;;  %vm1550_vm7 = vweird.f32 %v1542_v59 }
 0x57d   :  { %1803 = vrcp.f32 %v1543_v60  ;;  %v1571_v21 = vand.u32 2147483648, %v1543_v60  ;;  %v1569_v16 = vand.u32 2147483647, %v1543_v60  ;;  %vm1565_vm8 = vweird.f32 %v1543_v60 }
 0x57e   :  { %v1557_v32 = vor.u32 1.1754944e-38, %v1556_v17  ;;  %vm1555_vm11 = vcmp.eq.f32.partialorder %v1554_v35, 8.507059e+37 }
 0x57f   :  { %v1572_v24 = vor.u32 1.1754944e-38, %v1571_v21  ;;  %vm1570_vm12 = vcmp.eq.f32.partialorder %v1569_v16, 8.507059e+37 }
 0x580   :  { %v1800_v0 = vpop.eup %1799 }
 0x581   :  { %v1544_v47 = vadd.f32 1.0, %v1800_v0 }
 0x582   :  { %v1802_v55 = vpop.eup %1801 }
 0x583   :  { %v1804_v2 = vpop.eup %1803  ;;  %v1546_v6 = vmul.f32 %v1802_v55, %v1542_v59  ;;  %1805 = vrcp.f32 %v1544_v47  ;;  %vm1551_vm5 = vweird.f32 %v1802_v55  ;;  %v1586_v9 = vand.u32 2147483648, %v1544_v47 }
 0x584   :  { %v1561_v1 = vmul.f32 %v1804_v2, %v1543_v60  ;;  %1807 = vtanh.f32 %v1532_v54  ;;  %vm1566_vm6 = vweird.f32 %v1804_v2  ;;  %vm1552_vm9 = vmor %vm1550_vm7, %vm1551_vm5  ;;  %vm1580_vm14 = vweird.f32 %v1544_v47 }
 0x585   :  { %v1547_v20 = vsub.f32 1.0, %v1546_v6  ;;  %vm1567_vm10 = vmor %vm1565_vm8, %vm1566_vm6  ;;  %v1584_v4 = vand.u32 2147483647, %v1544_v47  ;;  %v1587_v38 = vor.u32 1.1754944e-38, %v1586_v9 }
 0x586   :  { %v1562_v36 = vsub.f32 1.0, %v1561_v1 }
 0x587   :  { %v1548_v12 = vmul.f32 %v1802_v55, %v1547_v20  ;;  %vm1585_vm0 = vcmp.eq.f32.partialorder %v1584_v4, 8.507059e+37 }
 0x588   :  { %v1563_v19 = vmul.f32 %v1804_v2, %v1562_v36 }
 0x589   :  { %v1806_v23 = vpop.eup %1805  ;;  %v1549_v11 = vadd.f32 %v1802_v55, %v1548_v12 }
 0x58a   :  { %v1576_v13 = vmul.f32 %v1806_v23, %v1544_v47  ;;  %v1564_v29 = vadd.f32 %v1804_v2, %v1563_v19  ;;  %v1808_v31 = vpop.eup %1807  ;;  %vm1581_vm13 = vweird.f32 %v1806_v23 }
 0x58b   :  { %v1553_v25 = vsel %vm1552_vm9, %v1802_v55, %v1549_v11  ;;  %vm1582_vm15 = vmor %vm1580_vm14, %vm1581_vm13 }
 0x58c   :  { %v1577_v15 = vsub.f32 1.0, %v1576_v13  ;;  %v1558_v28 = vsel %vm1555_vm11, %v1557_v32, %v1553_v25  ;;  %v1568_v10 = vsel %vm1567_vm10, %v1804_v2, %v1564_v29 }
 0x58d   :  { %v1573_v18 = vsel %vm1570_vm12, %v1572_v24, %v1568_v10  ;;  %v1592_v27 = vmul.f32 %v1808_v31, %v1558_v28 }
 0x58e   :  { %v1591_v22 = vmul.f32 %v1573_v18, %v2941_v40  ;;  %v1578_v14 = vmul.f32 %v1806_v23, %v1577_v15 }
 0x590   :  { %v1593_v26 = vadd.f32 %v1592_v27, %v1591_v22  ;;  %v1579_v30 = vadd.f32 %v1806_v23, %v1578_v14 }
 0x592   :  { %1809 = vtanh.f32 %v1593_v26  ;;  %v1583_v37 = vsel %vm1582_vm15, %v1806_v23, %v1579_v30 }
 0x593   :  { %v1588_v40 = vsel %vm1585_vm0, %v1587_v38, %v1583_v37 }
 0x598   :  { %v1810_v39 = vpop.eup %1809 }
 0x599   :  { %v1595_v41 = vmul.f32 %v1810_v39, %v1588_v40 }
 0x59b   :  { %1598 = vst [vmem:[#allocation8] sm:$0xff] %v1595_v41 }
 0x59c   :  { %1609 = dma.vmem_to_hbm [thread:$0]  %s1605_s27, 128, %s1607_s29, [#allocation7]  }
 0x59d   :  { %1925 = dma.done.wait [#allocation7], 128  }
 0x59e   :  { %1926 = vsyncadd [#allocation7], 4294967168 }
 0x59f   :  { %1614 = vsyncpa [#allocation6], 1 }
 0x5a0   :  { %1615 = vsyncpa [#allocation7], 1 }

</bundles_post_ra>
